<compile_context>
chip_gen: v7x
topology: tpu7x:2x2x1
jax: 0.10.0
libtpu: 0.0.40
codegen_flags: <defaults>
</compile_context>

<pallas_src>
import jax
import jax.numpy as jnp
import numpy as np
from jax.experimental import pallas as pl
from jax.experimental.pallas import tpu as pltpu

INPUT_SIZE = 7
HIDDEN = 64
N_SUBNETS = 4
SHARED_HIDDEN = 3        # shared trunk = 1 input linear + 3 hidden linears
SUBNET_HIDDEN = 4        # each subnet = 4 hidden linears + 1 head linear
WIDE = HIDDEN * N_SUBNETS   # 256: fused width of the four subnets
HALF = WIDE // 2            # 128: split width for 128x128-MXU chips


def _round_up(n, m):
    return (n + m - 1) // m * m


def _device_kind():
    try:
        return jax.devices()[0].device_kind.lower()
    except Exception:
        return ""


def _has_256_mxu():
    """v6e / v7x: native 256x256 MXU and bf16 VPU. v4/v5*: 128x128 MXU, no bf16 VALU."""
    kind = _device_kind()
    return ("v6" in kind) or ("v7" in kind)


# --------------------------------------------------------------------------------------
# Kernel (factory: parameterized on block-diag split + activation carry dtype)
# --------------------------------------------------------------------------------------
def _make_kernel(split_bd: bool, carry_dtype):
    def _body(x_ref, w0_ref, b0_ref, ws_ref, bs_ref, wcat_ref, bcat_ref,
              bd_refs, bbd_ref, whead_ref, bhead_ref, out_ref):
        wdt = w0_ref.dtype   # matmul operand dtype (bf16 by default)

        def lin_relu(a, w, b):
            y = jnp.dot(a.astype(wdt), w, preferred_element_type=jnp.float32) + b
            return jnp.maximum(y, 0.0).astype(carry_dtype)

        # ---- shared trunk: (TB,7)@(7,64), then 3 x (TB,64)@(64,64) ----
        h = lin_relu(x_ref[...], w0_ref[...], b0_ref[...])
        for l in range(SHARED_HIDDEN):
            h = lin_relu(h, ws_ref[l], bs_ref[l])

        # ---- four subnets fused: layer 0 is a true column-concat (TB,64)@(64,256) ----
        o = lin_relu(h, wcat_ref[...], bcat_ref[...])

        if split_bd:
            # 128x128-MXU chips: two (TB,128)@(128,128) block-diag matmuls per hidden
            # layer (subnets {0,1} / {2,3}); skips the all-zero off-diagonal 128-tiles.
            wbd_a_ref, wbd_b_ref = bd_refs
            oa = o[:, :HALF]
            ob = o[:, HALF:]
            for l in range(SUBNET_HIDDEN - 1):
                bl = bbd_ref[l]
                oa = lin_relu(oa, wbd_a_ref[l], bl[:, :HALF])
                ob = lin_relu(ob, wbd_b_ref[l], bl[:, HALF:])
            wh = whead_ref[...]
            heads = (jnp.dot(oa.astype(wdt), wh[:HALF, :],
                             preferred_element_type=jnp.float32)
                     + jnp.dot(ob.astype(wdt), wh[HALF:, :],
                               preferred_element_type=jnp.float32)
                     + bhead_ref[...])
        else:
            # 256x256-MXU chips: one fused (TB,256)@(256,256) per hidden layer.
            (wbd_ref,) = bd_refs
            for l in range(SUBNET_HIDDEN - 1):
                o = lin_relu(o, wbd_ref[l], bbd_ref[l])
            heads = jnp.dot(o.astype(wdt), whead_ref[...],
                            preferred_element_type=jnp.float32) + bhead_ref[...]

        # Fused heads -> single lane-dense (TB, 4) store (no width-1 masked stores).
        out_ref[...] = jnp.maximum(heads, 0.0).astype(out_ref.dtype)

    if split_bd:
        def kernel(x_ref, w0_ref, b0_ref, ws_ref, bs_ref, wcat_ref, bcat_ref,
                   wbd_a_ref, wbd_b_ref, bbd_ref, whead_ref, bhead_ref, out_ref):
            _body(x_ref, w0_ref, b0_ref, ws_ref, bs_ref, wcat_ref, bcat_ref,
                  (wbd_a_ref, wbd_b_ref), bbd_ref, whead_ref, bhead_ref, out_ref)
    else:
        def kernel(x_ref, w0_ref, b0_ref, ws_ref, bs_ref, wcat_ref, bcat_ref,
                   wbd_ref, bbd_ref, whead_ref, bhead_ref, out_ref):
            _body(x_ref, w0_ref, b0_ref, ws_ref, bs_ref, wcat_ref, bcat_ref,
                  (wbd_ref,), bbd_ref, whead_ref, bhead_ref, out_ref)
    return kernel


# --------------------------------------------------------------------------------------
# Parameter construction (packing done ONCE here, not in the kernel)
# --------------------------------------------------------------------------------------
def _xavier(key, fan_in, fan_out):
    bound = float(np.sqrt(6.0 / (fan_in + fan_out)))
    return jax.random.uniform(key, (fan_in, fan_out), jnp.float32,
                              minval=-bound, maxval=bound)


def init_params(key, dtype=jnp.bfloat16, split_block_diag=None):
    """Returns (packed_params_for_kernel, unpacked_f32_params_for_reference).

    dtype: operand dtype of the packed weights (bf16 default: MXU-native everywhere;
           accumulation stays f32 in-kernel).
    split_block_diag: pack subnet hidden layers as two (128,128) block-diagonals instead
           of one (256,256).  Defaults to True on 128x128-MXU chips (v4/v5).
    """
    if split_block_diag is None:
        split_block_diag = not _has_256_mxu()

    n_keys = 1 + SHARED_HIDDEN + N_SUBNETS * (SUBNET_HIDDEN + 1)
    ks = iter(jax.random.split(key, n_keys))

    # ---- unpacked (reference) parameters, float32 ----
    w0 = _xavier(next(ks), INPUT_SIZE, HIDDEN)                        # (7, 64)
    b0 = jnp.zeros((1, HIDDEN), jnp.float32)
    ws = jnp.stack([_xavier(next(ks), HIDDEN, HIDDEN)
                    for _ in range(SHARED_HIDDEN)])                   # (3, 64, 64)
    bs = jnp.zeros((SHARED_HIDDEN, 1, HIDDEN), jnp.float32)
    wsub = jnp.stack([jnp.stack([_xavier(next(ks), HIDDEN, HIDDEN)
                                 for _ in range(SUBNET_HIDDEN)])
                      for _ in range(N_SUBNETS)])                     # (4, 4, 64, 64)
    bsub = jnp.zeros((N_SUBNETS, SUBNET_HIDDEN, 1, HIDDEN), jnp.float32)
    whead = jnp.stack([_xavier(next(ks), HIDDEN, 1)
                       for _ in range(N_SUBNETS)])                    # (4, 64, 1)
    bhead = jnp.zeros((N_SUBNETS, 1, 1), jnp.float32)
    unpacked = (w0, b0, ws, bs, wsub, bsub, whead, bhead)

    # ---- packed kernel parameters ----
    wcat = jnp.concatenate([wsub[s, 0] for s in range(N_SUBNETS)], axis=1)   # (64, 256)
    bcat = jnp.concatenate([bsub[s, 0] for s in range(N_SUBNETS)], axis=1)   # (1, 256)
    bbd = jnp.stack([jnp.concatenate([bsub[s, l] for s in range(N_SUBNETS)], axis=1)
                     for l in range(1, SUBNET_HIDDEN)])                      # (3, 1, 256)

    def block_diag(mats):
        n = len(mats)
        out = jnp.zeros((n * HIDDEN, n * HIDDEN), jnp.float32)
        for s, m in enumerate(mats):
            out = out.at[s * HIDDEN:(s + 1) * HIDDEN,
                         s * HIDDEN:(s + 1) * HIDDEN].set(m)
        return out

    if split_block_diag:
        wbd_a = jnp.stack([block_diag([wsub[0, l], wsub[1, l]])
                           for l in range(1, SUBNET_HIDDEN)])                # (3, 128, 128)
        wbd_b = jnp.stack([block_diag([wsub[2, l], wsub[3, l]])
                           for l in range(1, SUBNET_HIDDEN)])                # (3, 128, 128)
        bd_weights = (wbd_a.astype(dtype), wbd_b.astype(dtype))
    else:
        wbd = jnp.stack([block_diag([wsub[s, l] for s in range(N_SUBNETS)])
                         for l in range(1, SUBNET_HIDDEN)])                  # (3, 256, 256)
        bd_weights = (wbd.astype(dtype),)

    whead_bd = jnp.zeros((WIDE, N_SUBNETS), jnp.float32)
    for s in range(N_SUBNETS):
        whead_bd = whead_bd.at[s * HIDDEN:(s + 1) * HIDDEN, s:s + 1].set(whead[s])
    bhead_cat = jnp.concatenate([bhead[s] for s in range(N_SUBNETS)], axis=1)  # (1, 4)

    packed = (w0.astype(dtype), b0, ws.astype(dtype), bs,
              wcat.astype(dtype), bcat) + bd_weights + (
              bbd, whead_bd.astype(dtype), bhead_cat)
    return packed, unpacked


# --------------------------------------------------------------------------------------
# Wrapper
# --------------------------------------------------------------------------------------
def _choose_tile(B, block_rows):
    """Batch tile: multiple of 8, <= block_rows, and (for B > 8) yielding an EVEN number
    of grid steps >= 2 so 'parallel' megacore sharding engages and balances on v7x."""
    block_rows = max(8, _round_up(int(block_rows), 8))
    if B <= 8:
        return 8
    k = 2
    while True:
        tb = _round_up(-(-B // k), 8)
        if tb <= block_rows:
            return tb
        k += 2


def shared_and_independent_forward(x, packed_params, *, block_rows=4096):
    """x: (B, 7) float32 -> tuple of four (B, 1) float32 outputs."""
    B, F = x.shape
    assert F == INPUT_SIZE

    split_bd = len(packed_params) == 11          # 11 arrays when block-diag is split
    wdt = packed_params[0].dtype
    # Carry inter-layer activations in bf16 only where the VPU has bf16 VALU (v6e/v7x).
    carry_dtype = wdt if (wdt == jnp.bfloat16 and _has_256_mxu()) else jnp.float32

    tb = _choose_tile(B, block_rows)
    grid = (pl.cdiv(B, tb),)
    # NOTE: when B % tb != 0 the last block computes on padded (undefined) rows of x.
    # This is benign because rows are fully independent and out-of-bounds output rows
    # are dropped by Pallas.  Do NOT add any cross-row reduction to this kernel.

    def row_spec(cols):
        return pl.BlockSpec((tb, cols), lambda i: (i, 0))

    def const_spec(shape):
        nd = len(shape)
        return pl.BlockSpec(shape, lambda i, _nd=nd: (0,) * _nd)  # VMEM-resident weights

    weight_specs = [const_spec(p.shape) for p in packed_params]

    # Executed FLOPs (block-diag split halves the subnet hidden-layer FLOPs).
    bd_macs = (SUBNET_HIDDEN - 1) * ((2 * HALF * HALF) if split_bd else (WIDE * WIDE))
    flops_per_row = 2 * (INPUT_SIZE * HIDDEN
                         + SHARED_HIDDEN * HIDDEN * HIDDEN
                         + HIDDEN * WIDE
                         + bd_macs
                         + WIDE * N_SUBNETS)
    weight_bytes = sum(int(np.prod(p.shape)) * p.dtype.itemsize for p in packed_params)
    cost = pl.CostEstimate(
        flops=int(flops_per_row) * int(B),
        transcendentals=0,
        bytes_accessed=int(B) * (INPUT_SIZE + N_SUBNETS) * 4 + int(weight_bytes))

    out = pl.pallas_call(
        _make_kernel(split_bd, carry_dtype),
        out_shape=jax.ShapeDtypeStruct((B, N_SUBNETS), jnp.float32),
        grid_spec=pltpu.PrefetchScalarGridSpec(
            num_scalar_prefetch=0,
            grid=grid,
            in_specs=[row_spec(INPUT_SIZE)] + weight_specs,
            out_specs=row_spec(N_SUBNETS)),
        compiler_params=pltpu.CompilerParams(
            dimension_semantics=("parallel",),         # megacore sharding on v7x
            vmem_limit_bytes=32 * 1024 * 1024),        # safe on v7x's 64 MiB VMEM
        cost_estimate=cost,
    )(x, *packed_params)

    return tuple(out[:, s:s + 1] for s in range(N_SUBNETS))


# --------------------------------------------------------------------------------------
# Pure-JAX reference (unpacked, per-subnet, float32)
# --------------------------------------------------------------------------------------
def reference_forward(x, unpacked):
    w0, b0, ws, bs, wsub, bsub, whead, bhead = unpacked
    h = jnp.maximum(x @ w0 + b0, 0.0)
    for l in range(SHARED_HIDDEN):
        h = jnp.maximum(h @ ws[l] + bs[l], 0.0)
    outs = []
    for s in range(N_SUBNETS):
        o = h
        for l in range(SUBNET_HIDDEN):
            o = jnp.maximum(o @ wsub[s, l] + bsub[s, l], 0.0)
        outs.append(jnp.maximum(o @ whead[s] + bhead[s], 0.0))
    return tuple(outs)


if __name__ == "__main__":
    key = jax.random.PRNGKey(0)
    k_param, k_x1, k_x2 = jax.random.split(key, 3)

    x_small = jax.random.normal(k_x1, (8, INPUT_SIZE), jnp.float32)
    x_big = jax.random.normal(k_x2, (700, INPUT_SIZE), jnp.float32)

    # 1) f32 weights, both block-diag layouts (fused 256 and split 2x128): tight check.
    for split in (False, True):
        packed_f32, unpacked = init_params(k_param, dtype=jnp.float32,
                                           split_block_diag=split)
        outs = jax.block_until_ready(shared_and_independent_forward(x_small, packed_f32))
        refs = reference_forward(x_small, unpacked)
        for o, r in zip(outs, refs):
            assert o.shape == (8, 1)
            np.testing.assert_allclose(np.asarray(o), np.asarray(r), rtol=1e-5, atol=1e-5)

    # 2) Larger batch with non-divisible tail: exercises even-step batch pipelining,
    #    VMEM-resident weights and tail masking (700 rows, tile 176 -> 4 grid steps).
    packed_auto_f32, unpacked = init_params(k_param, dtype=jnp.float32)
    outs_big = jax.block_until_ready(
        shared_and_independent_forward(x_big, packed_auto_f32, block_rows=256))
    refs_big = reference_forward(x_big, unpacked)
    for o, r in zip(outs_big, refs_big):
        assert o.shape == (700, 1)
        np.testing.assert_allclose(np.asarray(o), np.asarray(r), rtol=1e-5, atol=1e-5)

    # 3) Default path: bf16 operands (MXU-native), f32 accumulation; loose check.
    packed_bf16, _ = init_params(k_param)   # dtype=bf16, chip-appropriate packing
    outs_bf16 = jax.block_until_ready(shared_and_independent_forward(x_small, packed_bf16))
    refs_small = reference_forward(x_small, unpacked)
    for o, r in zip(outs_bf16, refs_small):
        np.testing.assert_allclose(np.asarray(o), np.asarray(r), rtol=1e-1, atol=1e-1)

    print("KERNEL_OK")
</pallas_src>

<mosaic_0001>
module attributes {stable_mosaic.version = 11 : i64} {
  func.func @kernel(%arg0: i32, %arg1: memref<8x7xf32, #tpu.memory_space<vmem>>, %arg2: memref<7x64xf32, #tpu.memory_space<vmem>>, %arg3: memref<1x64xf32, #tpu.memory_space<vmem>>, %arg4: memref<3x64x64xf32, #tpu.memory_space<vmem>>, %arg5: memref<3x1x64xf32, #tpu.memory_space<vmem>>, %arg6: memref<64x256xf32, #tpu.memory_space<vmem>>, %arg7: memref<1x256xf32, #tpu.memory_space<vmem>>, %arg8: memref<3x256x256xf32, #tpu.memory_space<vmem>>, %arg9: memref<3x1x256xf32, #tpu.memory_space<vmem>>, %arg10: memref<256x4xf32, #tpu.memory_space<vmem>>, %arg11: memref<1x4xf32, #tpu.memory_space<vmem>>, %arg12: memref<8x4xf32, #tpu.memory_space<vmem>>) attributes {dimension_semantics = [#tpu.dimension_semantics<parallel>], iteration_bounds = array<i64: 1>, scalar_prefetch = 0 : i64, scratch_operands = 0 : i64, tpu.core_type = #tpu.core_type<tc>, window_params = [{transform_indices = @transform_0, window_bounds = array<i64: 8, 7>}, {pipeline_mode = #tpu.pipeline_mode<synchronous>, transform_indices = @transform_1, window_bounds = array<i64: 7, 64>}, {pipeline_mode = #tpu.pipeline_mode<synchronous>, transform_indices = @transform_2, window_bounds = array<i64: 1, 64>}, {pipeline_mode = #tpu.pipeline_mode<synchronous>, transform_indices = @transform_3, window_bounds = array<i64: 3, 64, 64>}, {pipeline_mode = #tpu.pipeline_mode<synchronous>, transform_indices = @transform_4, window_bounds = array<i64: 3, 1, 64>}, {pipeline_mode = #tpu.pipeline_mode<synchronous>, transform_indices = @transform_5, window_bounds = array<i64: 64, 256>}, {pipeline_mode = #tpu.pipeline_mode<synchronous>, transform_indices = @transform_6, window_bounds = array<i64: 1, 256>}, {pipeline_mode = #tpu.pipeline_mode<synchronous>, transform_indices = @transform_7, window_bounds = array<i64: 3, 256, 256>}, {pipeline_mode = #tpu.pipeline_mode<synchronous>, transform_indices = @transform_8, window_bounds = array<i64: 3, 1, 256>}, {pipeline_mode = #tpu.pipeline_mode<synchronous>, transform_indices = @transform_9, window_bounds = array<i64: 256, 4>}, {pipeline_mode = #tpu.pipeline_mode<synchronous>, transform_indices = @transform_10, window_bounds = array<i64: 1, 4>}, {transform_indices = @transform_11, window_bounds = array<i64: 8, 4>}]} {
    %c0 = arith.constant 0 : index
    %c0_0 = arith.constant 0 : index
    %0 = vector.load %arg1[%c0, %c0_0] : memref<8x7xf32, #tpu.memory_space<vmem>>, vector<8x7xf32>
    %c0_1 = arith.constant 0 : index
    %c0_2 = arith.constant 0 : index
    %1 = vector.load %arg2[%c0_1, %c0_2] : memref<7x64xf32, #tpu.memory_space<vmem>>, vector<7x64xf32>
    %c0_3 = arith.constant 0 : index
    %c0_4 = arith.constant 0 : index
    %2 = vector.load %arg3[%c0_3, %c0_4] : memref<1x64xf32, #tpu.memory_space<vmem>>, vector<1x64xf32>
    %cst = arith.constant dense<0.000000e+00> : vector<8x64xf32>
    %3 = tpu.matmul %0, %1, %cst {dimension_numbers = #tpu.dot_dimension_numbers<[1], [0], [0], [1], [0, 0, 1, 1], [], []>} : vector<8x7xf32>, vector<7x64xf32>, vector<8x64xf32> -> vector<8x64xf32>
    %4 = vector.broadcast %2 : vector<1x64xf32> to vector<8x64xf32>
    %5 = arith.addf %3, %4 : vector<8x64xf32>
    %cst_5 = arith.constant 0.000000e+00 : f32
    %6 = vector.broadcast %cst_5 : f32 to vector<8x64xf32>
    %7 = arith.maximumf %5, %6 : vector<8x64xf32>
    %c0_6 = arith.constant 0 : index
    %c0_7 = arith.constant 0 : index
    %c0_8 = arith.constant 0 : index
    %8 = vector.load %arg4[%c0_6, %c0_7, %c0_8] : memref<3x64x64xf32, #tpu.memory_space<vmem>>, vector<1x64x64xf32>
    %9 = vector.shape_cast %8 : vector<1x64x64xf32> to vector<64x64xf32>
    %c0_9 = arith.constant 0 : index
    %c0_10 = arith.constant 0 : index
    %c0_11 = arith.constant 0 : index
    %10 = vector.load %arg5[%c0_9, %c0_10, %c0_11] : memref<3x1x64xf32, #tpu.memory_space<vmem>>, vector<1x1x64xf32>
    %11 = vector.shape_cast %10 : vector<1x1x64xf32> to vector<1x64xf32>
    %cst_12 = arith.constant dense<0.000000e+00> : vector<8x64xf32>
    %12 = tpu.matmul %7, %9, %cst_12 {dimension_numbers = #tpu.dot_dimension_numbers<[1], [0], [0], [1], [0, 0, 1, 1], [], []>} : vector<8x64xf32>, vector<64x64xf32>, vector<8x64xf32> -> vector<8x64xf32>
    %13 = vector.broadcast %11 : vector<1x64xf32> to vector<8x64xf32>
    %14 = arith.addf %12, %13 : vector<8x64xf32>
    %cst_13 = arith.constant 0.000000e+00 : f32
    %15 = vector.broadcast %cst_13 : f32 to vector<8x64xf32>
    %16 = arith.maximumf %14, %15 : vector<8x64xf32>
    %c1 = arith.constant 1 : index
    %c0_14 = arith.constant 0 : index
    %c0_15 = arith.constant 0 : index
    %17 = vector.load %arg4[%c1, %c0_14, %c0_15] : memref<3x64x64xf32, #tpu.memory_space<vmem>>, vector<1x64x64xf32>
    %18 = vector.shape_cast %17 : vector<1x64x64xf32> to vector<64x64xf32>
    %c1_16 = arith.constant 1 : index
    %c0_17 = arith.constant 0 : index
    %c0_18 = arith.constant 0 : index
    %19 = vector.load %arg5[%c1_16, %c0_17, %c0_18] : memref<3x1x64xf32, #tpu.memory_space<vmem>>, vector<1x1x64xf32>
    %20 = vector.shape_cast %19 : vector<1x1x64xf32> to vector<1x64xf32>
    %cst_19 = arith.constant dense<0.000000e+00> : vector<8x64xf32>
    %21 = tpu.matmul %16, %18, %cst_19 {dimension_numbers = #tpu.dot_dimension_numbers<[1], [0], [0], [1], [0, 0, 1, 1], [], []>} : vector<8x64xf32>, vector<64x64xf32>, vector<8x64xf32> -> vector<8x64xf32>
    %22 = vector.broadcast %20 : vector<1x64xf32> to vector<8x64xf32>
    %23 = arith.addf %21, %22 : vector<8x64xf32>
    %cst_20 = arith.constant 0.000000e+00 : f32
    %24 = vector.broadcast %cst_20 : f32 to vector<8x64xf32>
    %25 = arith.maximumf %23, %24 : vector<8x64xf32>
    %c2 = arith.constant 2 : index
    %c0_21 = arith.constant 0 : index
    %c0_22 = arith.constant 0 : index
    %26 = vector.load %arg4[%c2, %c0_21, %c0_22] : memref<3x64x64xf32, #tpu.memory_space<vmem>>, vector<1x64x64xf32>
    %27 = vector.shape_cast %26 : vector<1x64x64xf32> to vector<64x64xf32>
    %c2_23 = arith.constant 2 : index
    %c0_24 = arith.constant 0 : index
    %c0_25 = arith.constant 0 : index
    %28 = vector.load %arg5[%c2_23, %c0_24, %c0_25] : memref<3x1x64xf32, #tpu.memory_space<vmem>>, vector<1x1x64xf32>
    %29 = vector.shape_cast %28 : vector<1x1x64xf32> to vector<1x64xf32>
    %cst_26 = arith.constant dense<0.000000e+00> : vector<8x64xf32>
    %30 = tpu.matmul %25, %27, %cst_26 {dimension_numbers = #tpu.dot_dimension_numbers<[1], [0], [0], [1], [0, 0, 1, 1], [], []>} : vector<8x64xf32>, vector<64x64xf32>, vector<8x64xf32> -> vector<8x64xf32>
    %31 = vector.broadcast %29 : vector<1x64xf32> to vector<8x64xf32>
    %32 = arith.addf %30, %31 : vector<8x64xf32>
    %cst_27 = arith.constant 0.000000e+00 : f32
    %33 = vector.broadcast %cst_27 : f32 to vector<8x64xf32>
    %34 = arith.maximumf %32, %33 : vector<8x64xf32>
    %c0_28 = arith.constant 0 : index
    %c0_29 = arith.constant 0 : index
    %35 = vector.load %arg6[%c0_28, %c0_29] : memref<64x256xf32, #tpu.memory_space<vmem>>, vector<64x256xf32>
    %c0_30 = arith.constant 0 : index
    %c0_31 = arith.constant 0 : index
    %36 = vector.load %arg7[%c0_30, %c0_31] : memref<1x256xf32, #tpu.memory_space<vmem>>, vector<1x256xf32>
    %cst_32 = arith.constant dense<0.000000e+00> : vector<8x256xf32>
    %37 = tpu.matmul %34, %35, %cst_32 {dimension_numbers = #tpu.dot_dimension_numbers<[1], [0], [0], [1], [0, 0, 1, 1], [], []>} : vector<8x64xf32>, vector<64x256xf32>, vector<8x256xf32> -> vector<8x256xf32>
    %38 = vector.broadcast %36 : vector<1x256xf32> to vector<8x256xf32>
    %39 = arith.addf %37, %38 : vector<8x256xf32>
    %cst_33 = arith.constant 0.000000e+00 : f32
    %40 = vector.broadcast %cst_33 : f32 to vector<8x256xf32>
    %41 = arith.maximumf %39, %40 : vector<8x256xf32>
    %c0_34 = arith.constant 0 : index
    %c0_35 = arith.constant 0 : index
    %c0_36 = arith.constant 0 : index
    %42 = vector.load %arg8[%c0_34, %c0_35, %c0_36] : memref<3x256x256xf32, #tpu.memory_space<vmem>>, vector<1x256x256xf32>
    %43 = vector.shape_cast %42 : vector<1x256x256xf32> to vector<256x256xf32>
    %c0_37 = arith.constant 0 : index
    %c0_38 = arith.constant 0 : index
    %c0_39 = arith.constant 0 : index
    %44 = vector.load %arg9[%c0_37, %c0_38, %c0_39] : memref<3x1x256xf32, #tpu.memory_space<vmem>>, vector<1x1x256xf32>
    %45 = vector.shape_cast %44 : vector<1x1x256xf32> to vector<1x256xf32>
    %cst_40 = arith.constant dense<0.000000e+00> : vector<8x256xf32>
    %46 = tpu.matmul %41, %43, %cst_40 {dimension_numbers = #tpu.dot_dimension_numbers<[1], [0], [0], [1], [0, 0, 1, 1], [], []>} : vector<8x256xf32>, vector<256x256xf32>, vector<8x256xf32> -> vector<8x256xf32>
    %47 = vector.broadcast %45 : vector<1x256xf32> to vector<8x256xf32>
    %48 = arith.addf %46, %47 : vector<8x256xf32>
    %cst_41 = arith.constant 0.000000e+00 : f32
    %49 = vector.broadcast %cst_41 : f32 to vector<8x256xf32>
    %50 = arith.maximumf %48, %49 : vector<8x256xf32>
    %c1_42 = arith.constant 1 : index
    %c0_43 = arith.constant 0 : index
    %c0_44 = arith.constant 0 : index
    %51 = vector.load %arg8[%c1_42, %c0_43, %c0_44] : memref<3x256x256xf32, #tpu.memory_space<vmem>>, vector<1x256x256xf32>
    %52 = vector.shape_cast %51 : vector<1x256x256xf32> to vector<256x256xf32>
    %c1_45 = arith.constant 1 : index
    %c0_46 = arith.constant 0 : index
    %c0_47 = arith.constant 0 : index
    %53 = vector.load %arg9[%c1_45, %c0_46, %c0_47] : memref<3x1x256xf32, #tpu.memory_space<vmem>>, vector<1x1x256xf32>
    %54 = vector.shape_cast %53 : vector<1x1x256xf32> to vector<1x256xf32>
    %cst_48 = arith.constant dense<0.000000e+00> : vector<8x256xf32>
    %55 = tpu.matmul %50, %52, %cst_48 {dimension_numbers = #tpu.dot_dimension_numbers<[1], [0], [0], [1], [0, 0, 1, 1], [], []>} : vector<8x256xf32>, vector<256x256xf32>, vector<8x256xf32> -> vector<8x256xf32>
    %56 = vector.broadcast %54 : vector<1x256xf32> to vector<8x256xf32>
    %57 = arith.addf %55, %56 : vector<8x256xf32>
    %cst_49 = arith.constant 0.000000e+00 : f32
    %58 = vector.broadcast %cst_49 : f32 to vector<8x256xf32>
    %59 = arith.maximumf %57, %58 : vector<8x256xf32>
    %c2_50 = arith.constant 2 : index
    %c0_51 = arith.constant 0 : index
    %c0_52 = arith.constant 0 : index
    %60 = vector.load %arg8[%c2_50, %c0_51, %c0_52] : memref<3x256x256xf32, #tpu.memory_space<vmem>>, vector<1x256x256xf32>
    %61 = vector.shape_cast %60 : vector<1x256x256xf32> to vector<256x256xf32>
    %c2_53 = arith.constant 2 : index
    %c0_54 = arith.constant 0 : index
    %c0_55 = arith.constant 0 : index
    %62 = vector.load %arg9[%c2_53, %c0_54, %c0_55] : memref<3x1x256xf32, #tpu.memory_space<vmem>>, vector<1x1x256xf32>
    %63 = vector.shape_cast %62 : vector<1x1x256xf32> to vector<1x256xf32>
    %cst_56 = arith.constant dense<0.000000e+00> : vector<8x256xf32>
    %64 = tpu.matmul %59, %61, %cst_56 {dimension_numbers = #tpu.dot_dimension_numbers<[1], [0], [0], [1], [0, 0, 1, 1], [], []>} : vector<8x256xf32>, vector<256x256xf32>, vector<8x256xf32> -> vector<8x256xf32>
    %65 = vector.broadcast %63 : vector<1x256xf32> to vector<8x256xf32>
    %66 = arith.addf %64, %65 : vector<8x256xf32>
    %cst_57 = arith.constant 0.000000e+00 : f32
    %67 = vector.broadcast %cst_57 : f32 to vector<8x256xf32>
    %68 = arith.maximumf %66, %67 : vector<8x256xf32>
    %c0_58 = arith.constant 0 : index
    %c0_59 = arith.constant 0 : index
    %69 = vector.load %arg10[%c0_58, %c0_59] : memref<256x4xf32, #tpu.memory_space<vmem>>, vector<256x4xf32>
    %cst_60 = arith.constant dense<0.000000e+00> : vector<8x4xf32>
    %70 = tpu.matmul %68, %69, %cst_60 {dimension_numbers = #tpu.dot_dimension_numbers<[1], [0], [0], [1], [0, 0, 1, 1], [], []>} : vector<8x256xf32>, vector<256x4xf32>, vector<8x4xf32> -> vector<8x4xf32>
    %c0_61 = arith.constant 0 : index
    %c0_62 = arith.constant 0 : index
    %71 = vector.load %arg11[%c0_61, %c0_62] : memref<1x4xf32, #tpu.memory_space<vmem>>, vector<1x4xf32>
    %72 = vector.broadcast %71 : vector<1x4xf32> to vector<8x4xf32>
    %73 = arith.addf %70, %72 : vector<8x4xf32>
    %cst_63 = arith.constant 0.000000e+00 : f32
    %74 = vector.broadcast %cst_63 : f32 to vector<8x4xf32>
    %75 = arith.maximumf %73, %74 : vector<8x4xf32>
    %c0_64 = arith.constant 0 : index
    %c0_65 = arith.constant 0 : index
    %76 = vector.load %arg12[%c0_64, %c0_65] : memref<8x4xf32, #tpu.memory_space<vmem>>, vector<8x4xf32>
    tpu.vector_store %arg12[%c0_64, %c0_65], %75 {strides = array<i32>} : memref<8x4xf32, #tpu.memory_space<vmem>>, vector<8x4xf32>,
    return
  }
  func.func @transform_0(%arg0: i32) -> (i32, i32) {
    %c0_i32 = arith.constant 0 : i32
    %c0_i32_0 = arith.constant 0 : i32
    return %arg0, %c0_i32 : i32, i32
  }
  func.func @transform_1(%arg0: i32) -> (i32, i32) {
    %c0_i32 = arith.constant 0 : i32
    %c0_i32_0 = arith.constant 0 : i32
    %c0_i32_1 = arith.constant 0 : i32
    return %c0_i32, %c0_i32_0 : i32, i32
  }
  func.func @transform_2(%arg0: i32) -> (i32, i32) {
    %c0_i32 = arith.constant 0 : i32
    %c0_i32_0 = arith.constant 0 : i32
    %c0_i32_1 = arith.constant 0 : i32
    return %c0_i32, %c0_i32_0 : i32, i32
  }
  func.func @transform_3(%arg0: i32) -> (i32, i32, i32) {
    %c0_i32 = arith.constant 0 : i32
    %c0_i32_0 = arith.constant 0 : i32
    %c0_i32_1 = arith.constant 0 : i32
    %c0_i32_2 = arith.constant 0 : i32
    return %c0_i32, %c0_i32_0, %c0_i32_1 : i32, i32, i32
  }
  func.func @transform_4(%arg0: i32) -> (i32, i32, i32) {
    %c0_i32 = arith.constant 0 : i32
    %c0_i32_0 = arith.constant 0 : i32
    %c0_i32_1 = arith.constant 0 : i32
    %c0_i32_2 = arith.constant 0 : i32
    return %c0_i32, %c0_i32_0, %c0_i32_1 : i32, i32, i32
  }
  func.func @transform_5(%arg0: i32) -> (i32, i32) {
    %c0_i32 = arith.constant 0 : i32
    %c0_i32_0 = arith.constant 0 : i32
    %c0_i32_1 = arith.constant 0 : i32
    return %c0_i32, %c0_i32_0 : i32, i32
  }
  func.func @transform_6(%arg0: i32) -> (i32, i32) {
    %c0_i32 = arith.constant 0 : i32
    %c0_i32_0 = arith.constant 0 : i32
    %c0_i32_1 = arith.constant 0 : i32
    return %c0_i32, %c0_i32_0 : i32, i32
  }
  func.func @transform_7(%arg0: i32) -> (i32, i32, i32) {
    %c0_i32 = arith.constant 0 : i32
    %c0_i32_0 = arith.constant 0 : i32
    %c0_i32_1 = arith.constant 0 : i32
    %c0_i32_2 = arith.constant 0 : i32
    return %c0_i32, %c0_i32_0, %c0_i32_1 : i32, i32, i32
  }
  func.func @transform_8(%arg0: i32) -> (i32, i32, i32) {
    %c0_i32 = arith.constant 0 : i32
    %c0_i32_0 = arith.constant 0 : i32
    %c0_i32_1 = arith.constant 0 : i32
    %c0_i32_2 = arith.constant 0 : i32
    return %c0_i32, %c0_i32_0, %c0_i32_1 : i32, i32, i32
  }
  func.func @transform_9(%arg0: i32) -> (i32, i32) {
    %c0_i32 = arith.constant 0 : i32
    %c0_i32_0 = arith.constant 0 : i32
    %c0_i32_1 = arith.constant 0 : i32
    return %c0_i32, %c0_i32_0 : i32, i32
  }
  func.func @transform_10(%arg0: i32) -> (i32, i32) {
    %c0_i32 = arith.constant 0 : i32
    %c0_i32_0 = arith.constant 0 : i32
    %c0_i32_1 = arith.constant 0 : i32
    return %c0_i32, %c0_i32_0 : i32, i32
  }
  func.func @transform_11(%arg0: i32) -> (i32, i32) {
    %c0_i32 = arith.constant 0 : i32
    %c0_i32_0 = arith.constant 0 : i32
    return %arg0, %c0_i32 : i32, i32
  }
}

</mosaic_0001>

<bundles_post_ra>
// kernel: tpu_custom_call.1
= control target key start
LH: loop header
LB: loop body
LE: loop exit
PB: predicated region body
PF: predicated region fallthrough
CT: control target
= control target key end

     0   :  { %16 = vsyncpa [#allocation3], 0  ;;  %s1920_s0 = inlined_call_operand.vmem [shape: f32[8,7], index: 0, kind: input, shape index: {}]   ;;  %s1921_s1 = inlined_call_operand.vmem [shape: f32[7,64], index: 1, kind: input, shape index: {}]   ;;  %s1922_s2 = inlined_call_operand.vmem [shape: f32[1,64], index: 2, kind: input, shape index: {}]   ;;  %s1923_s3 = inlined_call_operand.vmem [shape: f32[3,64,64], index: 3, kind: input, shape index: {}]   ;;  %s1924_s4 = inlined_call_operand.vmem [shape: f32[3,1,64], index: 4, kind: input, shape index: {}]   ;;  %s1925_s5 = inlined_call_operand.hbm [shape: f32[64,256], index: 5, kind: input, shape index: {}]   ;;  %s1926_s6 = inlined_call_operand.vmem [shape: f32[1,256], index: 6, kind: input, shape index: {}]   ;;  %s1927_s7 = inlined_call_operand.hbm [shape: f32[3,256,256], index: 7, kind: input, shape index: {}]   ;;  %s1928_s8 = inlined_call_operand.vmem [shape: f32[3,1,256], index: 8, kind: input, shape index: {}]   ;;  %s1929_s9 = inlined_call_operand.vmem [shape: f32[256,4], index: 9, kind: input, shape index: {}]   ;;  %s1930_s10 = inlined_call_operand.vmem [shape: f32[1,4], index: 10, kind: input, shape index: {}]   ;;  %s1931_s11 = inlined_call_operand.vmem [shape: f32[8,4], index: 11, kind: output, shape index: {}]  }
   0x1   :  { %17 = vsyncpa [#allocation5], 0  ;;  %s1587_s17 = smov [#allocation2]   ;;  %s1539_s21 = scalar_lea.hbm %s1925_s5, 2048 }
   0x2   :  { %s33_s18 = sshll.u32 %s1587_s17, 4  ;;  %p1540_p0 = scmp.ne.s32.totalorder %s1925_s5, %s1539_s21  ;;  %s34_s18 = int_to_ptr.vmem [resolvable:$true] %s33_s18 }
   0x3   :  { %p1543_p1 = scmp.lt.u32.totalorder %s1539_s21, %s1925_s5 }
   0x5   :  { %p1545_p2 = pnand %p1543_p1, %p1540_p0 }
   0x7   :  { %1548 = shalt.err (!%p1545_p2)
}
   0x8   :  { %s1549_s26 = scalar_lea.vmem %s34_s18, 2048  ;;  %p1554_p4 = scmp.lt.s32.totalorder %s34_s18, %s34_s18 }
   0x9   :  { %p1550_p3 = scmp.ne.s32.totalorder %s34_s18, %s1549_s26  ;;  %p1555_p5 = scmp.lt.s32.totalorder %s1549_s26, %s1549_s26 }
   0xb   :  { %p1556_p6 = por %p1555_p5, %p1554_p4 }
   0xd   :  { %p1557_p7 = pnand %p1556_p6, %p1550_p3 }
   0xf   :  { %1560 = shalt.err (!%p1557_p7)
}
  0x10   :  { %s1588_s27 = smov 256   ;;  %s1589_s28 = smov 16  }
  0x11   :  { %39 = dma.hbm_to_vmem [thread:$0]  %s1925_s5, 2048, %s34_s18, [#allocation3], %s1588_s27, %s1588_s27, %s1589_s28  }
  0x12   :  { %s1590_s12 = smov [#allocation4]   ;;  %s1561_s16 = scalar_lea.hbm %s1927_s7, 24576 }
  0x13   :  { %s47_s13 = sshll.u32 %s1590_s12, 4  ;;  %p1562_p8 = scmp.ne.s32.totalorder %s1927_s7, %s1561_s16  ;;  %s48_s13 = int_to_ptr.vmem [resolvable:$true] %s47_s13 }
  0x14   :  { %p1565_p9 = scmp.lt.u32.totalorder %s1561_s16, %s1927_s7 }
  0x16   :  { %p1567_p10 = pnand %p1565_p9, %p1562_p8 }
  0x18   :  { %1570 = shalt.err (!%p1567_p10)
}
  0x19   :  { %s1571_s22 = scalar_lea.vmem %s48_s13, 24576  ;;  %p1576_p12 = scmp.lt.s32.totalorder %s48_s13, %s48_s13 }
  0x1a   :  { %p1572_p11 = scmp.ne.s32.totalorder %s48_s13, %s1571_s22  ;;  %p1577_p13 = scmp.lt.s32.totalorder %s1571_s22, %s1571_s22 }
  0x1c   :  { %p1578_p0 = por %p1577_p13, %p1576_p12 }
  0x1e   :  { %p1579_p1 = pnand %p1578_p0, %p1572_p11 }
  0x20   :  { %1582 = shalt.err (!%p1579_p1)
}
  0x21   :  { %53 = dma.hbm_to_vmem [thread:$0]  %s1927_s7, 24576, %s48_s13, [#allocation5], %s1588_s27, %s1588_s27, %s1589_s28  }
  0x22   :  { %1583 = dma.done.wait [#allocation3], 2048  }
  0x23   :  { %1584 = vsyncadd [#allocation3], 4294965248 }
  0x24   :  { %1585 = dma.done.wait [#allocation5], 24576  }
  0x25   :  { %1586 = vsyncadd [#allocation5], 4294942720  ;;  %v1591_v0 = vmov 0.0   ;;  %vm1592_vm0 = vmmov 0   ;;  %v1593_v1 = vmov 0.0|0.0   ;;  %vm79_vm1 = vcmask 1046528  }
  0x26   :  { %1194 = vmatprep.subr.mxu0 %v1591_v0  ;;  %1196 = vmatprep.mubr.msk.f32.mxu0 %vm1592_vm0, %v1591_v0  ;;  %vm75_vm2 = vcmask 56320   ;;  %v67_v2 = vld [vmem:[%s1921_s1] sm:$0x7f]  ;;  %v155_v5 = vld [vmem:[%s1923_s3 + $0x8] sm:$0xff]  ;;  %v156_v6 = vld [vmem:[%s1923_s3 + $0x10] sm:$0xff]  ;;  %vm169_vm3 = vcmask 523264  }
  0x27   :  { %1280 = vmatprep.subr.bf16.mxu1 %v1593_v1  ;;  %1253 = vmatprep.mubr.msk.f32.mxu1 %vm1592_vm0, %v1591_v0  ;;  %v66_v3 = vld [vmem:[%s1920_s0] sm:$0xff]  ;;  %v157_v7 = vld [vmem:[%s1923_s3 + $0x18] sm:$0xff]  ;;  %v159_v11 = vld [vmem:[%s1923_s3 + $0x28] sm:$0xff]  ;;  %vm1091_vm4 = vcmask 31744  }
  0x28   :  { %v154_v4 = vld [vmem:[%s1923_s3] sm:$0xff]  ;;  %1195 = vmatpush3.msk.msra.mxu0 %vm79_vm1, %v67_v2  ;;  %v1260_v9 = vpack.c.bf16 %v157_v7, %v156_v6  ;;  %v160_v13 = vld [vmem:[%s1923_s3 + $0x30] sm:$0xff]  ;;  %v161_v14 = vld [vmem:[%s1923_s3 + $0x38] sm:$0xff] }
  0x29   :  { %1197 = vmatmul.mubr.msk.f32.vlgmr.msra.gmra.mrb[0].mxu0 %vm75_vm2, %v66_v3  ;;  %1256 = vmatprep.subr.bf16.mxu0 %v1593_v1  ;;  %v1257_v8 = vpack.c.bf16 %v155_v5, %v154_v4  ;;  %v158_v10 = vld [vmem:[%s1923_s3 + $0x20] sm:$0xff]  ;;  %v1266_v15 = vpack.c.bf16 %v161_v14, %v160_v13  ;;  %v1105_v18 = vld [vmem:[%s1923_s3 + $0x48] sm:$0xff]  ;;  %v1106_v24 = vld [vmem:[%s1923_s3 + $0x50] sm:$0xff] }
  0x2a   :  { %1215 = vmatprep.mubr.msk.f32.mxu0 %vm1592_vm0, %v1591_v0  ;;  %v1263_v12 = vpack.c.bf16 %v159_v11, %v158_v10  ;;  %v1099_v16 = vld [vmem:[%s1922_s2] ss:$0 sm:$0xff]  ;;  %v1107_v25 = vld [vmem:[%s1923_s3 + $0x58] sm:$0xff]  ;;  %v1109_v28 = vld [vmem:[%s1923_s3 + $0x68] sm:$0xff] }
  0x2b   :  { %1258 = vmatpush3.bf16.msra.mxu0 %v1257_v8  ;;  %v1104_v17 = vld [vmem:[%s1923_s3 + $0x40] sm:$0xff]  ;;  %v1272_v26 = vpack.c.bf16 %v1107_v25, %v1106_v24  ;;  %v1110_v30 = vld [vmem:[%s1923_s3 + $0x70] sm:$0xff]  ;;  %v1111_v31 = vld [vmem:[%s1923_s3 + $0x78] sm:$0xff] }
  0x2c   :  { %1259 = vmatprep.subr.bf16.mxu0 %v1593_v1  ;;  %v1269_v22 = vpack.c.bf16 %v1105_v18, %v1104_v17  ;;  %v1108_v27 = vld [vmem:[%s1923_s3 + $0x60] sm:$0xff]  ;;  %v1278_v32 = vpack.c.bf16 %v1111_v31, %v1110_v30  ;;  %v1116_v34 = vld [vmem:[%s1923_s3 + $0x88] sm:$0xff]  ;;  %v1117_v35 = vld [vmem:[%s1923_s3 + $0x90] sm:$0xff] }
  0x2d   :  { %v1275_v29 = vpack.c.bf16 %v1109_v28, %v1108_v27  ;;  %v1115_v33 = vld [vmem:[%s1923_s3 + $0x80] sm:$0xff]  ;;  %v1118_v37 = vld [vmem:[%s1923_s3 + $0x98] sm:$0xff]  ;;  %v1120_v40 = vld [vmem:[%s1923_s3 + $0xa8] sm:$0xff] }
  0x2e   :  { %v1281_v36 = vpack.c.bf16 %v1116_v34, %v1115_v33  ;;  %v1284_v38 = vpack.c.bf16 %v1118_v37, %v1117_v35  ;;  %v1119_v39 = vld [vmem:[%s1923_s3 + $0xa0] sm:$0xff]  ;;  %v1121_v47 = vld [vmem:[%s1923_s3 + $0xb0] sm:$0xff]  ;;  %v1122_v48 = vld [vmem:[%s1923_s3 + $0xb8] sm:$0xff] }
  0x2f   :  { %1261 = vmatpush3.bf16.msra.mxu0 %v1260_v9  ;;  %v1287_v41 = vpack.c.bf16 %v1120_v40, %v1119_v39  ;;  %v1102_v42 = vld [vmem:[%s1924_s4] ss:$0 sm:$0xff]  ;;  %v1290_v49 = vpack.c.bf16 %v1122_v48, %v1121_v47  ;;  %v427_v50 = vld [vmem:[#allocation2 + $0x8] sm:$0xff]  ;;  %v429_v51 = vld [vmem:[#allocation2 + $0x18] sm:$0xff] }
  0x30   :  { %1262 = vmatprep.subr.bf16.mxu0 %v1593_v1  ;;  %1282 = vmatpush3.bf16.msra.mxu1 %v1281_v36  ;;  %v426_v52 = vld [vmem:[#allocation2] sm:$0xff]  ;;  %v1292_v53 = vpack.c.bf16 %v429_v51, %v427_v50  ;;  %v428_v54 = vld [vmem:[#allocation2 + $0x10] sm:$0xff]  ;;  %v431_v55 = vld [vmem:[#allocation2 + $0x28] sm:$0xff] }
  0x31   :  { %1283 = vmatprep.subr.bf16.mxu1 %v1593_v1  ;;  %v433_v56 = vld [vmem:[#allocation2 + $0x38] sm:$0xff]  ;;  %v1294_v57 = vpack.c.bf16 %v428_v54, %v426_v52  ;;  %v430_v59 = vld [vmem:[#allocation2 + $0x20] sm:$0xff]  ;;  %v432_v60 = vld [vmem:[#allocation2 + $0x30] sm:$0xff] }
  0x32   :  { %v1296_v58 = vpack.c.bf16 %v433_v56, %v431_v55  ;;  %v435_v61 = vld [vmem:[#allocation2 + $0x48] sm:$0xff]  ;;  %v437_v62 = vld [vmem:[#allocation2 + $0x58] sm:$0xff]  ;;  %v1298_v63 = vpack.c.bf16 %v432_v60, %v430_v59  ;;  %v436_v2 = vld [vmem:[#allocation2 + $0x50] sm:$0xff] }
  0x33   :  { %1264 = vmatpush3.bf16.msra.mxu0 %v1263_v12  ;;  %v1113_v4 = vld [vmem:[%s1924_s4 + $0x1] ss:$0 sm:$0xff]  ;;  %v439_v9 = vld [vmem:[#allocation2 + $0x68] sm:$0xff]  ;;  %v441_v10 = vld [vmem:[#allocation2 + $0x78] sm:$0xff] }
  0x34   :  { %1265 = vmatprep.subr.bf16.mxu0 %v1593_v1  ;;  %1285 = vmatpush3.bf16.msra.mxu1 %v1284_v38  ;;  %v1304_v11 = vpack.c.bf16 %v441_v10, %v439_v9  ;;  %v438_v12 = vld [vmem:[#allocation2 + $0x60] sm:$0xff]  ;;  %v440_v13 = vld [vmem:[#allocation2 + $0x70] sm:$0xff]  ;;  %v541_v27 = vld [vmem:[#allocation4 + $0x58] sm:$0xff] }
  0x35   :  { %1286 = vmatprep.subr.bf16.mxu1 %v1593_v1  ;;  %v1306_v14 = vpack.c.bf16 %v440_v13, %v438_v12  ;;  %v530_v17 = vld [vmem:[#allocation4] sm:$0xff]  ;;  %v536_v25 = vld [vmem:[#allocation4 + $0x30] sm:$0xff]  ;;  %v545_v33 = vld [vmem:[#allocation4 + $0x78] sm:$0xff] }
  0x36   :  { %v534_v24 = vld [vmem:[#allocation4 + $0x20] sm:$0xff]  ;;  %v540_v31 = vld [vmem:[#allocation4 + $0x50] sm:$0xff]  ;;  %v547_v38 = vld [vmem:[#allocation4 + $0x88] sm:$0xff] }
  0x37   :  { %1267 = vmatpush3.bf16.msra.mxu0 %v1266_v15  ;;  %v531_v15 = vld [vmem:[#allocation4 + $0x8] sm:$0xff]  ;;  %v1314_v28 = vpack.c.bf16 %v536_v25, %v534_v24  ;;  %v538_v30 = vld [vmem:[#allocation4 + $0x40] sm:$0xff]  ;;  %v544_v37 = vld [vmem:[#allocation4 + $0x70] sm:$0xff] }
  0x38   :  { %1268 = vmatprep.subr.bf16.mxu0 %v1593_v1  ;;  %1288 = vmatpush3.bf16.msra.mxu1 %v1287_v41  ;;  %v1318_v34 = vpack.c.bf16 %v540_v31, %v538_v30  ;;  %v542_v36 = vld [vmem:[#allocation4 + $0x60] sm:$0xff]  ;;  %v549_v39 = vld [vmem:[#allocation4 + $0x98] sm:$0xff]  ;;  %v555_v50 = vld [vmem:[#allocation4 + $0xc8] sm:$0xff] }
  0x39   :  { %1289 = vmatprep.subr.bf16.mxu1 %v1593_v1  ;;  %v1322_v40 = vpack.c.bf16 %v544_v37, %v542_v36  ;;  %v1324_v41 = vpack.c.bf16 %v549_v39, %v547_v38  ;;  %v550_v48 = vld [vmem:[#allocation4 + $0xa0] sm:$0xff]  ;;  %v557_v51 = vld [vmem:[#allocation4 + $0xd8] sm:$0xff]  ;;  %v556_v55 = vld [vmem:[#allocation4 + $0xd0] sm:$0xff] }
  0x3a   :  { %v554_v54 = vld [vmem:[#allocation4 + $0xc0] sm:$0xff]  ;;  %v559_v56 = vld [vmem:[#allocation4 + $0xe8] sm:$0xff]  ;;  %v568_v9 = vld [vmem:[#allocation4 + $0x130] sm:$0xff] }
  0x3b   :  { %v558_v60 = vld [vmem:[#allocation4 + $0xe0] sm:$0xff]  ;;  %v571_v10 = vld [vmem:[#allocation4 + $0x148] sm:$0xff] }
  0x3c   :  { %1291 = vmatpush3.bf16.msra.mxu1 %v1290_v49  ;;  %v552_v49 = vld [vmem:[#allocation4 + $0xb0] sm:$0xff]  ;;  %v1124_v38 = vld [vmem:[%s1924_s4 + $0x2] ss:$0 sm:$0xff] }
  0x3d   :  { %v1330_v52 = vpack.c.bf16 %v552_v49, %v550_v48  ;;  %v590_v49 = vld [vmem:[#allocation4 + $0x1e0] sm:$0xff] }
  0xfc   :  { %v149_v19 = vpop.f32.mrb[0].mxu0 }
  0xfd   :  { %v150_v20 = vadd.f32 %v1099_v16, %v149_v19  ;;  %v1198_v21 = vpop.f32.mrb[1].mxu0  ;;  %v533_v16 = vld [vmem:[#allocation4 + $0x18] sm:$0xff]  ;;  %v532_v19 = vld [vmem:[#allocation4 + $0x10] sm:$0xff] }
  0xfe   :  { %v1308_v18 = vpack.c.bf16 %v533_v16, %v531_v15  ;;  %v537_v21 = vld [vmem:[#allocation4 + $0x38] sm:$0xff]  ;;  %v572_v15 = vld [vmem:[#allocation4 + $0x150] sm:$0xff]  ;;  %v575_v16 = vld [vmem:[#allocation4 + $0x168] sm:$0xff] }
  0xff   :  { %v153_v23 = vmax.f32 %v150_v20, 0.0  ;;  %v535_v20 = vld [vmem:[#allocation4 + $0x28] sm:$0xff] }
 0x100   :  { %1309 = vmatprep.subr.bf16.mxu1 %v1308_v18 }
 0x101   :  { %1216 = vmatmul.mubr.msk.f32.vlgmr.msra.gmra.mrb[2].mxu0 %vm169_vm3, %v153_v23  ;;  %v1312_v23 = vpack.c.bf16 %v537_v21, %v535_v20  ;;  %v574_v20 = vld [vmem:[#allocation4 + $0x160] sm:$0xff]  ;;  %v576_v21 = vld [vmem:[#allocation4 + $0x170] sm:$0xff] }
 0x102   :  { %1270 = vmatpush3.bf16.msra.mxu0 %v1269_v22  ;;  %1234 = vmatprep.mubr.msk.f32.mxu0 %vm1592_vm0, %v1591_v0  ;;  %v1310_v22 = vpack.c.bf16 %v532_v19, %v530_v17  ;;  %v577_v17 = vld [vmem:[#allocation4 + $0x178] sm:$0xff]  ;;  %v1354_v24 = vpack.c.bf16 %v576_v21, %v574_v20  ;;  %v700_v21 = vld [vmem:[#allocation4 + $0x2a0] sm:$0xff] }
 0x103   :  { %1271 = vmatprep.subr.bf16.mxu0 %v1593_v1  ;;  %v1352_v19 = vpack.c.bf16 %v577_v17, %v575_v16  ;;  %v698_v16 = vld [vmem:[#allocation4 + $0x290] sm:$0xff]  ;;  %v701_v17 = vld [vmem:[#allocation4 + $0x2a8] sm:$0xff] }
 0x106   :  { %1273 = vmatpush3.bf16.msra.mxu0 %v1272_v26  ;;  %v539_v26 = vld [vmem:[#allocation4 + $0x48] sm:$0xff] }
 0x107   :  { %1274 = vmatprep.subr.bf16.mxu0 %v1593_v1 }
 0x10a   :  { %1276 = vmatpush3.bf16.msra.mxu0 %v1275_v29  ;;  %v1316_v29 = vpack.c.bf16 %v541_v27, %v539_v26  ;;  %v578_v26 = vld [vmem:[#allocation4 + $0x180] sm:$0xff]  ;;  %v580_v27 = vld [vmem:[#allocation4 + $0x190] sm:$0xff] }
 0x10b   :  { %1277 = vmatprep.subr.bf16.mxu0 %v1593_v1  ;;  %v434_v1 = vld [vmem:[#allocation2 + $0x40] sm:$0xff]  ;;  %v1358_v30 = vpack.c.bf16 %v580_v27, %v578_v26 }
 0x10c   :  { %v1302_v3 = vpack.c.bf16 %v436_v2, %v434_v1  ;;  %v562_v2 = vld [vmem:[#allocation4 + $0x100] sm:$0xff] }
 0x10d   :  { %v704_v27 = vld [vmem:[#allocation4 + $0x2c0] sm:$0xff] }
 0x10e   :  { %1279 = vmatpush3.bf16.msra.mxu0 %v1278_v32  ;;  %v543_v32 = vld [vmem:[#allocation4 + $0x68] sm:$0xff] }
 0x10f   :  { %1293 = vmatprep.subr.bf16.mxu0 %v1292_v53  ;;  %v1320_v35 = vpack.c.bf16 %v545_v33, %v543_v32  ;;  %v1332_v53 = vpack.c.bf16 %v557_v51, %v555_v50  ;;  %v582_v32 = vld [vmem:[#allocation4 + $0x1a0] sm:$0xff]  ;;  %v584_v33 = vld [vmem:[#allocation4 + $0x1b0] sm:$0xff] }
 0x110   :  { %v1362_v36 = vpack.c.bf16 %v584_v33, %v582_v32  ;;  %v592_v50 = vld [vmem:[#allocation4 + $0x1f0] sm:$0xff]  ;;  %v708_v33 = vld [vmem:[#allocation4 + $0x2e0] sm:$0xff] }
 0x111   :  { %v1370_v51 = vpack.c.bf16 %v592_v50, %v590_v49 }
 0x1d4   :  { %v239_v43 = vpop.f32.mrb[2].mxu0 }
 0x1d5   :  { %v240_v44 = vadd.f32 %v1102_v42, %v239_v43  ;;  %v1217_v45 = vpop.f32.mrb[3].mxu0  ;;  %v546_v42 = vld [vmem:[#allocation4 + $0x80] sm:$0xff]  ;;  %v548_v43 = vld [vmem:[#allocation4 + $0x90] sm:$0xff] }
 0x1d6   :  { %v553_v45 = vld [vmem:[#allocation4 + $0xb8] sm:$0xff] }
 0x1d7   :  { %v243_v46 = vmax.f32 %v240_v44, 0.0  ;;  %v551_v44 = vld [vmem:[#allocation4 + $0xa8] sm:$0xff] }
 0x1d8   :  { %v1328_v47 = vpack.c.bf16 %v553_v45, %v551_v44  ;;  %v588_v44 = vld [vmem:[#allocation4 + $0x1d0] sm:$0xff] }
 0x1d9   :  { %1235 = vmatmul.mubr.msk.f32.vlgmr.msra.gmra.mrb[4].mxu0 %vm169_vm3, %v243_v46  ;;  %v1326_v46 = vpack.c.bf16 %v548_v43, %v546_v42  ;;  %v586_v43 = vld [vmem:[#allocation4 + $0x1c0] sm:$0xff] }
 0x1da   :  { %521 = vmatprep.mubr.f32.mxu0 %v1591_v0  ;;  %1295 = vmatpush1.bf16.msra.mxu0 %v1294_v57  ;;  %v1300_v0 = vpack.c.bf16 %v437_v62, %v435_v61  ;;  %v561_v57 = vld [vmem:[#allocation4 + $0xf8] sm:$0xff]  ;;  %v560_v61 = vld [vmem:[#allocation4 + $0xf0] sm:$0xff]  ;;  %v563_v62 = vld [vmem:[#allocation4 + $0x108] sm:$0xff]  ;;  %v1366_v45 = vpack.c.bf16 %v588_v44, %v586_v43 }
 0x1db   :  { %1297 = vmatprep.subr.bf16.mxu0 %v1296_v58  ;;  %v1334_v58 = vpack.c.bf16 %v556_v55, %v554_v54  ;;  %v1336_v59 = vpack.c.bf16 %v561_v57, %v559_v56  ;;  %v680_v54 = vld [vmem:[#allocation4 + $0x200] sm:$0xff]  ;;  %v682_v56 = vld [vmem:[#allocation4 + $0x210] sm:$0xff]  ;;  %v685_v57 = vld [vmem:[#allocation4 + $0x228] sm:$0xff] }
 0x1de   :  { %1299 = vmatpush1.bf16.msra.mxu0 %v1298_v63  ;;  %v565_v63 = vld [vmem:[#allocation4 + $0x118] sm:$0xff] }
 0x1df   :  { %1301 = vmatprep.subr.bf16.mxu0 %v1300_v0  ;;  %v1338_v0 = vpack.c.bf16 %v560_v61, %v558_v60  ;;  %v1340_v1 = vpack.c.bf16 %v565_v63, %v563_v62  ;;  %v684_v61 = vld [vmem:[#allocation4 + $0x220] sm:$0xff]  ;;  %v686_v62 = vld [vmem:[#allocation4 + $0x230] sm:$0xff]  ;;  %v689_v63 = vld [vmem:[#allocation4 + $0x248] sm:$0xff] }
 0x1e2   :  { %1303 = vmatpush1.bf16.msra.mxu0 %v1302_v3  ;;  %v564_v3 = vld [vmem:[#allocation4 + $0x110] sm:$0xff] }
 0x1e3   :  { %1305 = vmatprep.subr.bf16.mxu0 %v1304_v11  ;;  %v573_v11 = vld [vmem:[#allocation4 + $0x158] sm:$0xff] }
 0x1e4   :  { %v1348_v13 = vpack.c.bf16 %v573_v11, %v571_v10  ;;  %v694_v10 = vld [vmem:[#allocation4 + $0x270] sm:$0xff]  ;;  %v697_v11 = vld [vmem:[#allocation4 + $0x288] sm:$0xff] }
 0x1e6   :  { %1307 = vmatpush1.bf16.msra.mxu0 %v1306_v14  ;;  %v570_v14 = vld [vmem:[#allocation4 + $0x140] sm:$0xff] }
 0x1e7   :  { %v1350_v18 = vpack.c.bf16 %v572_v15, %v570_v14  ;;  %v696_v15 = vld [vmem:[#allocation4 + $0x280] sm:$0xff] }
 0x2ac   :  { %v330_v5 = vpop.f32.mrb[4].mxu0 }
 0x2ad   :  { %v331_v6 = vadd.f32 %v1113_v4, %v330_v5  ;;  %v1236_v7 = vpop.f32.mrb[5].mxu0  ;;  %v567_v4 = vld [vmem:[#allocation4 + $0x128] sm:$0xff]  ;;  %v569_v5 = vld [vmem:[#allocation4 + $0x138] sm:$0xff] }
 0x2ae   :  { %v1344_v7 = vpack.c.bf16 %v569_v5, %v567_v4  ;;  %v690_v4 = vld [vmem:[#allocation4 + $0x250] sm:$0xff]  ;;  %v693_v5 = vld [vmem:[#allocation4 + $0x268] sm:$0xff] }
 0x2af   :  { %v334_v8 = vmax.f32 %v331_v6, 0.0  ;;  %v1342_v6 = vpack.c.bf16 %v564_v3, %v562_v2  ;;  %v688_v3 = vld [vmem:[#allocation4 + $0x240] sm:$0xff] }
 0x2b1   :  { %1254 = vmatmul.mubr.msk.f32.vlgmr.msra.gmra.mrb[0].mxu1 %vm169_vm3, %v334_v8  ;;  %v566_v8 = vld [vmem:[#allocation4 + $0x120] sm:$0xff] }
 0x2b2   :  { %1311 = vmatpush1.bf16.msra.mxu1 %v1310_v22  ;;  %v1346_v12 = vpack.c.bf16 %v568_v9, %v566_v8  ;;  %v579_v22 = vld [vmem:[#allocation4 + $0x188] sm:$0xff]  ;;  %v692_v9 = vld [vmem:[#allocation4 + $0x260] sm:$0xff] }
 0x2b3   :  { %1313 = vmatprep.subr.bf16.mxu1 %v1312_v23  ;;  %v581_v23 = vld [vmem:[#allocation4 + $0x198] sm:$0xff] }
 0x2b4   :  { %v1356_v25 = vpack.c.bf16 %v581_v23, %v579_v22  ;;  %v702_v22 = vld [vmem:[#allocation4 + $0x2b0] sm:$0xff]  ;;  %v705_v23 = vld [vmem:[#allocation4 + $0x2c8] sm:$0xff] }
 0x2b6   :  { %1315 = vmatpush1.bf16.msra.mxu1 %v1314_v28  ;;  %v583_v28 = vld [vmem:[#allocation4 + $0x1a8] sm:$0xff] }
 0x2b7   :  { %1317 = vmatprep.subr.bf16.mxu1 %v1316_v29  ;;  %v585_v29 = vld [vmem:[#allocation4 + $0x1b8] sm:$0xff] }
 0x2b8   :  { %v1360_v31 = vpack.c.bf16 %v585_v29, %v583_v28  ;;  %v706_v28 = vld [vmem:[#allocation4 + $0x2d0] sm:$0xff]  ;;  %v709_v29 = vld [vmem:[#allocation4 + $0x2e8] sm:$0xff] }
 0x2ba   :  { %1319 = vmatpush1.bf16.msra.mxu1 %v1318_v34  ;;  %v587_v34 = vld [vmem:[#allocation4 + $0x1c8] sm:$0xff] }
 0x2bb   :  { %1321 = vmatprep.subr.bf16.mxu1 %v1320_v35  ;;  %v589_v35 = vld [vmem:[#allocation4 + $0x1d8] sm:$0xff] }
 0x2bc   :  { %v1364_v37 = vpack.c.bf16 %v589_v35, %v587_v34  ;;  %v710_v34 = vld [vmem:[#allocation4 + $0x2f0] sm:$0xff]  ;;  %v713_v35 = vld [vmem:[#allocation4 + $0x308] sm:$0xff] }
 0x2be   :  { %1323 = vmatpush1.bf16.msra.mxu1 %v1322_v40 }
 0x2bf   :  { %1325 = vmatprep.subr.bf16.mxu1 %v1324_v41 }
 0x2c2   :  { %1327 = vmatpush1.bf16.msra.mxu1 %v1326_v46  ;;  %v591_v46 = vld [vmem:[#allocation4 + $0x1e8] sm:$0xff] }
 0x2c3   :  { %1329 = vmatprep.subr.bf16.mxu1 %v1328_v47  ;;  %v593_v47 = vld [vmem:[#allocation4 + $0x1f8] sm:$0xff] }
 0x2c4   :  { %v1368_v48 = vpack.c.bf16 %v593_v47, %v591_v46  ;;  %v718_v46 = vld [vmem:[#allocation4 + $0x330] sm:$0xff]  ;;  %v721_v47 = vld [vmem:[#allocation4 + $0x348] sm:$0xff] }
 0x2c6   :  { %1331 = vmatpush1.bf16.msra.mxu1 %v1330_v52  ;;  %v681_v52 = vld [vmem:[#allocation4 + $0x208] sm:$0xff] }
 0x2c7   :  { %1333 = vmatprep.subr.bf16.mxu1 %v1332_v53  ;;  %v683_v53 = vld [vmem:[#allocation4 + $0x218] sm:$0xff] }
 0x2c8   :  { %v1372_v55 = vpack.c.bf16 %v683_v53, %v681_v52  ;;  %v722_v52 = vld [vmem:[#allocation4 + $0x350] sm:$0xff]  ;;  %v725_v53 = vld [vmem:[#allocation4 + $0x368] sm:$0xff] }
 0x2ca   :  { %1335 = vmatpush1.bf16.msra.mxu1 %v1334_v58  ;;  %v687_v58 = vld [vmem:[#allocation4 + $0x238] sm:$0xff]  ;;  %1373 = vmatprep.subr.bf16.mxu0 %v1372_v55 }
 0x2cb   :  { %1337 = vmatprep.subr.bf16.mxu1 %v1336_v59  ;;  %v1374_v59 = vpack.c.bf16 %v682_v56, %v680_v54  ;;  %v1376_v60 = vpack.c.bf16 %v687_v58, %v685_v57  ;;  %v727_v54 = vld [vmem:[#allocation4 + $0x378] sm:$0xff]  ;;  %v724_v57 = vld [vmem:[#allocation4 + $0x360] sm:$0xff]  ;;  %v726_v58 = vld [vmem:[#allocation4 + $0x370] sm:$0xff] }
 0x2cc   :  { %v1416_v56 = vpack.c.bf16 %v727_v54, %v725_v53  ;;  %v843_v54 = vld [vmem:[#allocation4 + $0x460] sm:$0xff] }
 0x2ce   :  { %1339 = vmatpush1.bf16.msra.mxu1 %v1338_v0  ;;  %v691_v0 = vld [vmem:[#allocation4 + $0x258] sm:$0xff] }
 0x2cf   :  { %1341 = vmatprep.subr.bf16.mxu1 %v1340_v1  ;;  %v1378_v1 = vpack.c.bf16 %v686_v62, %v684_v61  ;;  %v1380_v2 = vpack.c.bf16 %v691_v0, %v689_v63  ;;  %v1418_v61 = vpack.c.bf16 %v726_v58, %v724_v57  ;;  %v728_v63 = vld [vmem:[#allocation4 + $0x380] sm:$0xff]  ;;  %v730_v0 = vld [vmem:[#allocation4 + $0x390] sm:$0xff]  ;;  %v850_v57 = vld [vmem:[#allocation4 + $0x498] sm:$0xff] }
 0x2d2   :  { %1343 = vmatpush1.bf16.msra.mxu1 %v1342_v6  ;;  %v695_v6 = vld [vmem:[#allocation4 + $0x278] sm:$0xff] }
 0x2d3   :  { %1345 = vmatprep.subr.bf16.mxu1 %v1344_v7  ;;  %v1382_v7 = vpack.c.bf16 %v690_v4, %v688_v3  ;;  %v1384_v8 = vpack.c.bf16 %v695_v6, %v693_v5  ;;  %v1422_v3 = vpack.c.bf16 %v730_v0, %v728_v63  ;;  %v732_v5 = vld [vmem:[#allocation4 + $0x3a0] sm:$0xff]  ;;  %v734_v6 = vld [vmem:[#allocation4 + $0x3b0] sm:$0xff]  ;;  %v854_v63 = vld [vmem:[#allocation4 + $0x4b8] sm:$0xff] }
 0x2d6   :  { %1347 = vmatpush1.bf16.msra.mxu1 %v1346_v12  ;;  %v699_v12 = vld [vmem:[#allocation4 + $0x298] sm:$0xff] }
 0x2d7   :  { %1349 = vmatprep.subr.bf16.mxu1 %v1348_v13  ;;  %v1386_v13 = vpack.c.bf16 %v694_v10, %v692_v9  ;;  %v1388_v14 = vpack.c.bf16 %v699_v12, %v697_v11  ;;  %v1426_v9 = vpack.c.bf16 %v734_v6, %v732_v5  ;;  %v444_v11 = vlaneseq  ;;  %v858_v5 = vld [vmem:[#allocation4 + $0x4d8] sm:$0xff] }
 0x2d9   :  { %v445_v12 = vshrl.u32 %v444_v11, 7  ;;  %v862_v11 = vld [vmem:[#allocation4 + $0x4f8] sm:$0xff] }
 0x2da   :  { %1351 = vmatpush1.bf16.msra.mxu1 %v1350_v18  ;;  %v703_v18 = vld [vmem:[#allocation4 + $0x2b8] sm:$0xff] }
 0x2db   :  { %1353 = vmatprep.subr.bf16.mxu1 %v1352_v19  ;;  %v1390_v19 = vpack.c.bf16 %v698_v16, %v696_v15  ;;  %v1392_v20 = vpack.c.bf16 %v703_v18, %v701_v17  ;;  %v1799_v15 = vsub.s32 1, %v445_v12 }
 0x2de   :  { %1355 = vmatpush1.bf16.msra.mxu1 %v1354_v24  ;;  %v707_v24 = vld [vmem:[#allocation4 + $0x2d8] sm:$0xff] }
 0x2df   :  { %1357 = vmatprep.subr.bf16.mxu1 %v1356_v25  ;;  %v1394_v25 = vpack.c.bf16 %v702_v22, %v700_v21  ;;  %v1396_v26 = vpack.c.bf16 %v707_v24, %v705_v23  ;;  %v736_v24 = vld [vmem:[#allocation4 + $0x3c0] sm:$0xff] }
 0x2e2   :  { %1359 = vmatpush1.bf16.msra.mxu1 %v1358_v30  ;;  %v711_v30 = vld [vmem:[#allocation4 + $0x2f8] sm:$0xff] }
 0x2e3   :  { %1361 = vmatprep.subr.bf16.mxu1 %v1360_v31  ;;  %v1398_v31 = vpack.c.bf16 %v706_v28, %v704_v27  ;;  %v1400_v32 = vpack.c.bf16 %v711_v30, %v709_v29  ;;  %v741_v27 = vld [vmem:[#allocation4 + $0x3e8] sm:$0xff]  ;;  %v743_v28 = vld [vmem:[#allocation4 + $0x3f8] sm:$0xff]  ;;  %v740_v30 = vld [vmem:[#allocation4 + $0x3e0] sm:$0xff] }
 0x2e4   :  { %v1432_v29 = vpack.c.bf16 %v743_v28, %v741_v27  ;;  %v867_v28 = vld [vmem:[#allocation4 + $0x520] sm:$0xff] }
 0x2e6   :  { %1363 = vmatpush1.bf16.msra.mxu1 %v1362_v36  ;;  %v715_v36 = vld [vmem:[#allocation4 + $0x318] sm:$0xff] }
 0x2e7   :  { %1365 = vmatprep.subr.bf16.mxu1 %v1364_v37  ;;  %v1402_v37 = vpack.c.bf16 %v710_v34, %v708_v33  ;;  %v832_v33 = vld [vmem:[#allocation4 + $0x408] sm:$0xff]  ;;  %v834_v34 = vld [vmem:[#allocation4 + $0x418] sm:$0xff] }
 0x2ea   :  { %1367 = vmatpush1.bf16.msra.mxu1 %v1366_v45  ;;  %v716_v45 = vld [vmem:[#allocation4 + $0x320] sm:$0xff] }
 0x2eb   :  { %1369 = vmatprep.subr.bf16.mxu1 %v1368_v48  ;;  %v723_v48 = vld [vmem:[#allocation4 + $0x358] sm:$0xff]  ;;  %v1410_v49 = vpack.c.bf16 %v718_v46, %v716_v45 }
 0x2ec   :  { %v1412_v50 = vpack.c.bf16 %v723_v48, %v721_v47  ;;  %v842_v45 = vld [vmem:[#allocation4 + $0x458] sm:$0xff]  ;;  %v839_v48 = vld [vmem:[#allocation4 + $0x440] sm:$0xff] }
 0x2ee   :  { %1371 = vmatpush1.bf16.msra.mxu1 %v1370_v51  ;;  %v720_v51 = vld [vmem:[#allocation4 + $0x340] sm:$0xff] }
 0x2ef   :  { %v1414_v55 = vpack.c.bf16 %v722_v52, %v720_v51  ;;  %v846_v51 = vld [vmem:[#allocation4 + $0x478] sm:$0xff] }
 0x384   :  { %v421_v39 = vpop.f32.mrb[0].mxu1 }
 0x385   :  { %v422_v40 = vadd.f32 %v1124_v38, %v421_v39  ;;  %v1255_v41 = vpop.f32.mrb[1].mxu1  ;;  %v1404_v38 = vpack.c.bf16 %v715_v36, %v713_v35  ;;  %v712_v39 = vld [vmem:[#allocation4 + $0x300] sm:$0xff]  ;;  %v1436_v36 = vpack.c.bf16 %v834_v34, %v832_v33 }
 0x386   :  { %v717_v41 = vld [vmem:[#allocation4 + $0x328] sm:$0xff]  ;;  %v831_v35 = vld [vmem:[#allocation4 + $0x400] sm:$0xff] }
 0x387   :  { %v425_v42 = vmax.f32 %v422_v40, 0.0  ;;  %v714_v40 = vld [vmem:[#allocation4 + $0x310] sm:$0xff]  ;;  %1437 = vmatprep.subr.bf16.mxu1 %v1436_v36  ;;  %v871_v34 = vld [vmem:[#allocation4 + $0x540] sm:$0xff]  ;;  %v876_v36 = vld [vmem:[#allocation4 + $0x568] sm:$0xff] }
 0x388   :  { %v1406_v43 = vpack.c.bf16 %v714_v40, %v712_v39  ;;  %v838_v39 = vld [vmem:[#allocation4 + $0x438] sm:$0xff] }
 0x389   :  { %1126 = vmatmul.mubr.msk.f32.vlgmr.msra.gmra.mrb[6].mxu0 %vm169_vm3, %v425_v42  ;;  %v719_v42 = vld [vmem:[#allocation4 + $0x338] sm:$0xff] }
 0x38a   :  { %1375 = vmatpush1.bf16.msra.mxu0 %v1374_v59  ;;  %v1408_v44 = vpack.c.bf16 %v719_v42, %v717_v41  ;;  %v729_v59 = vld [vmem:[#allocation4 + $0x388] sm:$0xff]  ;;  %v835_v42 = vld [vmem:[#allocation4 + $0x420] sm:$0xff] }
 0x38b   :  { %1377 = vmatprep.subr.bf16.mxu0 %v1376_v60  ;;  %v731_v60 = vld [vmem:[#allocation4 + $0x398] sm:$0xff] }
 0x38c   :  { %v1420_v62 = vpack.c.bf16 %v731_v60, %v729_v59  ;;  %v847_v60 = vld [vmem:[#allocation4 + $0x480] sm:$0xff] }
 0x38e   :  { %1379 = vmatpush1.bf16.msra.mxu0 %v1378_v1  ;;  %v733_v1 = vld [vmem:[#allocation4 + $0x3a8] sm:$0xff] }
 0x38f   :  { %1381 = vmatprep.subr.bf16.mxu0 %v1380_v2  ;;  %v735_v2 = vld [vmem:[#allocation4 + $0x3b8] sm:$0xff] }
 0x390   :  { %v1424_v4 = vpack.c.bf16 %v735_v2, %v733_v1  ;;  %v851_v2 = vld [vmem:[#allocation4 + $0x4a0] sm:$0xff] }
 0x392   :  { %1383 = vmatpush1.bf16.msra.mxu0 %v1382_v7  ;;  %v737_v7 = vld [vmem:[#allocation4 + $0x3c8] sm:$0xff] }
 0x393   :  { %1385 = vmatprep.subr.bf16.mxu0 %v1384_v8  ;;  %v739_v8 = vld [vmem:[#allocation4 + $0x3d8] sm:$0xff] }
 0x394   :  { %v1428_v10 = vpack.c.bf16 %v739_v8, %v737_v7  ;;  %v855_v8 = vld [vmem:[#allocation4 + $0x4c0] sm:$0xff] }
 0x396   :  { %1387 = vmatpush1.bf16.msra.mxu0 %v1386_v13  ;;  %v1794_v13 = vsub.s32 0, %v445_v12 }
 0x397   :  { %1389 = vmatprep.subr.bf16.mxu0 %v1388_v14  ;;  %v442_v14 = vld [vmem:[%s1926_s6] sm:$0x3] }
 0x398   :  { %v447_v16 = vrot.slane %v442_v14, %v1794_v13  ;;  %v451_v17 = vrot.slane %v442_v14, %v1799_v15 }
 0x39a   :  { %1391 = vmatpush1.bf16.msra.mxu0 %v1390_v19 }
 0x39b   :  { %1393 = vmatprep.subr.bf16.mxu0 %v1392_v20 }
 0x39e   :  { %1395 = vmatpush1.bf16.msra.mxu0 %v1394_v25  ;;  %v738_v25 = vld [vmem:[#allocation4 + $0x3d0] sm:$0xff] }
 0x39f   :  { %1397 = vmatprep.subr.bf16.mxu0 %v1396_v26  ;;  %v1430_v26 = vpack.c.bf16 %v738_v25, %v736_v24  ;;  %v868_v24 = vld [vmem:[#allocation4 + $0x528] sm:$0xff]  ;;  %v870_v25 = vld [vmem:[#allocation4 + $0x538] sm:$0xff] }
 0x3a0   :  { %v1472_v27 = vpack.c.bf16 %v870_v25, %v868_v24  ;;  %v984_v24 = vld [vmem:[%s1929_s9 + $0x18] sm:$0xff]  ;;  %v1001_v25 = vld [vmem:[%s1929_s9 + $0xa0] sm:$0xff] }
 0x3a2   :  { %1399 = vmatpush1.bf16.msra.mxu0 %v1398_v31  ;;  %v742_v31 = vld [vmem:[#allocation4 + $0x3f0] sm:$0xff] }
 0x3a3   :  { %1401 = vmatprep.subr.bf16.mxu0 %v1400_v32  ;;  %v1434_v32 = vpack.c.bf16 %v742_v31, %v740_v30  ;;  %v872_v30 = vld [vmem:[#allocation4 + $0x548] sm:$0xff]  ;;  %v874_v31 = vld [vmem:[#allocation4 + $0x558] sm:$0xff] }
 0x3a4   :  { %v1476_v33 = vpack.c.bf16 %v874_v31, %v872_v30  ;;  %v986_v30 = vld [vmem:[%s1929_s9 + $0x28] sm:$0xff]  ;;  %v1003_v31 = vld [vmem:[%s1929_s9 + $0xb0] sm:$0xff] }
 0x3a6   :  { %1403 = vmatpush1.bf16.msra.mxu0 %v1402_v37  ;;  %v833_v37 = vld [vmem:[#allocation4 + $0x410] sm:$0xff] }
 0x3a7   :  { %1405 = vmatprep.subr.bf16.mxu0 %v1404_v38  ;;  %v836_v38 = vld [vmem:[#allocation4 + $0x428] sm:$0xff]  ;;  %v1438_v40 = vpack.c.bf16 %v833_v37, %v831_v35  ;;  %v873_v35 = vld [vmem:[#allocation4 + $0x550] sm:$0xff]  ;;  %v878_v37 = vld [vmem:[#allocation4 + $0x578] sm:$0xff] }
 0x3a8   :  { %v1440_v41 = vpack.c.bf16 %v838_v39, %v836_v38  ;;  %v1478_v38 = vpack.c.bf16 %v873_v35, %v871_v34  ;;  %v1480_v39 = vpack.c.bf16 %v878_v37, %v876_v36  ;;  %v987_v35 = vld [vmem:[%s1929_s9 + $0x30] sm:$0xff]  ;;  %v988_v36 = vld [vmem:[%s1929_s9 + $0x38] sm:$0xff]  ;;  %v1005_v37 = vld [vmem:[%s1929_s9 + $0xc0] sm:$0xff] }
 0x3aa   :  { %1407 = vmatpush1.bf16.msra.mxu0 %v1406_v43  ;;  %v837_v43 = vld [vmem:[#allocation4 + $0x430] sm:$0xff] }
 0x3ab   :  { %1409 = vmatprep.subr.bf16.mxu0 %v1408_v44  ;;  %v840_v44 = vld [vmem:[#allocation4 + $0x448] sm:$0xff]  ;;  %v1442_v46 = vpack.c.bf16 %v837_v43, %v835_v42  ;;  %v882_v43 = vld [vmem:[#allocation4 + $0x598] sm:$0xff] }
 0x3ac   :  { %v1444_v47 = vpack.c.bf16 %v842_v45, %v840_v44  ;;  %v880_v42 = vld [vmem:[#allocation4 + $0x588] sm:$0xff] }
 0x3ad   :  { %v1484_v45 = vpack.c.bf16 %v882_v43, %v880_v42  ;;  %v990_v42 = vld [vmem:[%s1929_s9 + $0x48] sm:$0xff]  ;;  %v1007_v43 = vld [vmem:[%s1929_s9 + $0xd0] sm:$0xff] }
 0x3ae   :  { %1411 = vmatpush1.bf16.msra.mxu0 %v1410_v49  ;;  %v841_v49 = vld [vmem:[#allocation4 + $0x450] sm:$0xff] }
 0x3af   :  { %1413 = vmatprep.subr.bf16.mxu0 %v1412_v50  ;;  %v844_v50 = vld [vmem:[#allocation4 + $0x468] sm:$0xff]  ;;  %v1446_v52 = vpack.c.bf16 %v841_v49, %v839_v48  ;;  %v886_v49 = vld [vmem:[#allocation4 + $0x5b8] sm:$0xff] }
 0x3b0   :  { %v1448_v53 = vpack.c.bf16 %v846_v51, %v844_v50  ;;  %v884_v48 = vld [vmem:[#allocation4 + $0x5a8] sm:$0xff] }
 0x3b1   :  { %v1488_v51 = vpack.c.bf16 %v886_v49, %v884_v48  ;;  %v992_v48 = vld [vmem:[%s1929_s9 + $0x58] sm:$0xff]  ;;  %v1009_v49 = vld [vmem:[%s1929_s9 + $0xe0] sm:$0xff] }
 0x3b2   :  { %1415 = vmatpush1.bf16.msra.mxu0 %v1414_v55  ;;  %v845_v55 = vld [vmem:[#allocation4 + $0x470] sm:$0xff] }
 0x3b3   :  { %1417 = vmatprep.subr.bf16.mxu0 %v1416_v56  ;;  %v848_v56 = vld [vmem:[#allocation4 + $0x488] sm:$0xff]  ;;  %v1450_v58 = vpack.c.bf16 %v845_v55, %v843_v54  ;;  %v890_v55 = vld [vmem:[#allocation4 + $0x5d8] sm:$0xff] }
 0x3b4   :  { %v1452_v59 = vpack.c.bf16 %v850_v57, %v848_v56  ;;  %v888_v54 = vld [vmem:[#allocation4 + $0x5c8] sm:$0xff] }
 0x3b5   :  { %v1492_v57 = vpack.c.bf16 %v890_v55, %v888_v54 }
 0x3b6   :  { %1419 = vmatpush1.bf16.msra.mxu0 %v1418_v61  ;;  %v849_v61 = vld [vmem:[#allocation4 + $0x490] sm:$0xff] }
 0x3b7   :  { %1421 = vmatprep.subr.bf16.mxu0 %v1420_v62  ;;  %v852_v62 = vld [vmem:[#allocation4 + $0x4a8] sm:$0xff]  ;;  %v1454_v0 = vpack.c.bf16 %v849_v61, %v847_v60 }
 0x3b8   :  { %v1456_v1 = vpack.c.bf16 %v854_v63, %v852_v62 }
 0x3ba   :  { %1423 = vmatpush1.bf16.msra.mxu0 %v1422_v3  ;;  %v853_v3 = vld [vmem:[#allocation4 + $0x4b0] sm:$0xff] }
 0x3bb   :  { %1425 = vmatprep.subr.bf16.mxu0 %v1424_v4  ;;  %v856_v4 = vld [vmem:[#allocation4 + $0x4c8] sm:$0xff]  ;;  %v1458_v6 = vpack.c.bf16 %v853_v3, %v851_v2  ;;  %v887_v3 = vld [vmem:[#allocation4 + $0x5c0] sm:$0xff] }
 0x3bc   :  { %v1460_v7 = vpack.c.bf16 %v858_v5, %v856_v4  ;;  %v889_v4 = vld [vmem:[#allocation4 + $0x5d0] sm:$0xff] }
 0x3bd   :  { %v1494_v5 = vpack.c.bf16 %v889_v4, %v887_v3  ;;  %v995_v4 = vld [vmem:[%s1929_s9 + $0x70] sm:$0xff] }
 0x3be   :  { %1427 = vmatpush1.bf16.msra.mxu0 %v1426_v9  ;;  %v857_v9 = vld [vmem:[#allocation4 + $0x4d0] sm:$0xff] }
 0x3bf   :  { %1429 = vmatprep.subr.bf16.mxu0 %v1428_v10  ;;  %v860_v10 = vld [vmem:[#allocation4 + $0x4e8] sm:$0xff]  ;;  %v1462_v12 = vpack.c.bf16 %v857_v9, %v855_v8  ;;  %v891_v9 = vld [vmem:[#allocation4 + $0x5e0] sm:$0xff] }
 0x3c0   :  { %v1464_v14 = vpack.c.bf16 %v862_v11, %v860_v10  ;;  %v893_v10 = vld [vmem:[#allocation4 + $0x5f0] sm:$0xff] }
 0x3c1   :  { %v1498_v11 = vpack.c.bf16 %v893_v10, %v891_v9 }
 0x3c2   :  { %1431 = vmatpush1.bf16.msra.mxu0 %v1430_v26 }
 0x3c3   :  { %1433 = vmatprep.subr.bf16.mxu0 %v1432_v29  ;;  %v869_v29 = vld [vmem:[#allocation4 + $0x530] sm:$0xff] }
 0x3c6   :  { %1435 = vmatpush1.bf16.msra.mxu0 %v1434_v32  ;;  %v1474_v32 = vpack.c.bf16 %v869_v29, %v867_v28  ;;  %v985_v29 = vld [vmem:[%s1929_s9 + $0x20] sm:$0xff] }
 0x45c   :  { %v523_v18 = vpop.f32.mrb[6].mxu0 }
 0x45d   :  { %v524_v19 = vadd.f32 %v523_v18, %v447_v16  ;;  %v525_v20 = vpop.f32.mrb[7].mxu0  ;;  %v859_v16 = vld [vmem:[#allocation4 + $0x4e0] sm:$0xff]  ;;  %v864_v18 = vld [vmem:[#allocation4 + $0x508] sm:$0xff] }
 0x45e   :  { %v526_v21 = vadd.f32 %v525_v20, %v451_v17  ;;  %v861_v17 = vld [vmem:[#allocation4 + $0x4f0] sm:$0xff] }
 0x45f   :  { %v528_v23 = vmax.f32 %v524_v19, 0.0  ;;  %v866_v19 = vld [vmem:[#allocation4 + $0x518] sm:$0xff]  ;;  %v1466_v20 = vpack.c.bf16 %v861_v17, %v859_v16  ;;  %v981_v16 = vld [vmem:[%s1929_s9] sm:$0xff] }
 0x460   :  { %v529_v22 = vmax.f32 %v526_v21, 0.0  ;;  %v1468_v21 = vpack.c.bf16 %v866_v19, %v864_v18  ;;  %v982_v18 = vld [vmem:[%s1929_s9 + $0x8] sm:$0xff]  ;;  %v999_v19 = vld [vmem:[%s1929_s9 + $0x90] sm:$0xff] }
 0x462   :  { %670 = vmatprep.mubr.f32.mxu1 %v529_v22  ;;  %v863_v22 = vld [vmem:[#allocation4 + $0x500] sm:$0xff] }
 0x463   :  { %671 = vmatmul.mubr.f32.vlgmr.msra.gmra.mrb[2].mxu1 %v528_v23  ;;  %v865_v23 = vld [vmem:[#allocation4 + $0x510] sm:$0xff] }
 0x464   :  { %1439 = vmatpush1.bf16.msra.mxu1 %v1438_v40  ;;  %v1470_v26 = vpack.c.bf16 %v865_v23, %v863_v22  ;;  %v875_v40 = vld [vmem:[#allocation4 + $0x560] sm:$0xff]  ;;  %v983_v23 = vld [vmem:[%s1929_s9 + $0x10] sm:$0xff] }
 0x465   :  { %1441 = vmatprep.subr.bf16.mxu1 %v1440_v41  ;;  %v877_v41 = vld [vmem:[#allocation4 + $0x570] sm:$0xff] }
 0x466   :  { %v1482_v44 = vpack.c.bf16 %v877_v41, %v875_v40  ;;  %v989_v41 = vld [vmem:[%s1929_s9 + $0x40] sm:$0xff] }
 0x468   :  { %1443 = vmatpush1.bf16.msra.mxu1 %v1442_v46  ;;  %v879_v46 = vld [vmem:[#allocation4 + $0x580] sm:$0xff] }
 0x469   :  { %1445 = vmatprep.subr.bf16.mxu1 %v1444_v47  ;;  %v881_v47 = vld [vmem:[#allocation4 + $0x590] sm:$0xff] }
 0x46a   :  { %v1486_v50 = vpack.c.bf16 %v881_v47, %v879_v46  ;;  %v991_v47 = vld [vmem:[%s1929_s9 + $0x50] sm:$0xff] }
 0x46c   :  { %1447 = vmatpush1.bf16.msra.mxu1 %v1446_v52  ;;  %v883_v52 = vld [vmem:[#allocation4 + $0x5a0] sm:$0xff] }
 0x46d   :  { %1449 = vmatprep.subr.bf16.mxu1 %v1448_v53  ;;  %v885_v53 = vld [vmem:[#allocation4 + $0x5b0] sm:$0xff] }
 0x46e   :  { %v1490_v56 = vpack.c.bf16 %v885_v53, %v883_v52  ;;  %v1127_v53 = vld [vmem:[%s1928_s8 + $0x2] sm:$0x3] }
 0x46f   :  { %v750_v54 = vrot.slane %v1127_v53, %v1794_v13  ;;  %v754_v55 = vrot.slane %v1127_v53, %v1799_v15 }
 0x470   :  { %1451 = vmatpush1.bf16.msra.mxu1 %v1450_v58  ;;  %v594_v58 = vld [vmem:[%s1928_s8] sm:$0x3] }
 0x471   :  { %1453 = vmatprep.subr.bf16.mxu1 %v1452_v59  ;;  %v599_v59 = vrot.slane %v594_v58, %v1794_v13  ;;  %v603_v60 = vrot.slane %v594_v58, %v1799_v15 }
 0x474   :  { %1455 = vmatpush1.bf16.msra.mxu1 %v1454_v0 }
 0x475   :  { %1457 = vmatprep.subr.bf16.mxu1 %v1456_v1 }
 0x478   :  { %1459 = vmatpush1.bf16.msra.mxu1 %v1458_v6  ;;  %v892_v6 = vld [vmem:[#allocation4 + $0x5e8] sm:$0xff] }
 0x479   :  { %1461 = vmatprep.subr.bf16.mxu1 %v1460_v7  ;;  %v894_v7 = vld [vmem:[#allocation4 + $0x5f8] sm:$0xff] }
 0x47a   :  { %v1496_v8 = vpack.c.bf16 %v894_v7, %v892_v6  ;;  %v1128_v7 = vld [vmem:[%s1928_s8 + $0x4] sm:$0x3] }
 0x47b   :  { %v905_v9 = vrot.slane %v1128_v7, %v1799_v15 }
 0x47c   :  { %1463 = vmatpush1.bf16.msra.mxu1 %v1462_v12  ;;  %v997_v12 = vld [vmem:[%s1929_s9 + $0x80] sm:$0xff] }
 0x47d   :  { %1465 = vmatprep.subr.bf16.mxu1 %v1464_v14  ;;  %v998_v14 = vld [vmem:[%s1929_s9 + $0x88] sm:$0xff] }
 0x47e   :  { %v1500_v17 = vpack.c.bf16 %v998_v14, %v997_v12 }
 0x480   :  { %1467 = vmatpush1.bf16.msra.mxu1 %v1466_v20  ;;  %v1000_v20 = vld [vmem:[%s1929_s9 + $0x98] sm:$0xff]  ;;  %1501 = vmatprep.subr.bf16.mxu0 %v1500_v17 }
 0x481   :  { %1469 = vmatprep.subr.bf16.mxu1 %v1468_v21  ;;  %v1502_v21 = vpack.c.bf16 %v982_v18, %v981_v16  ;;  %v1504_v22 = vpack.c.bf16 %v1000_v20, %v999_v19  ;;  %v1129_v19 = vld [vmem:[%s1930_s10] ss:$0 sm:$0xff] }
 0x484   :  { %1471 = vmatpush1.bf16.msra.mxu1 %v1470_v26  ;;  %v1002_v26 = vld [vmem:[%s1929_s9 + $0xa8] sm:$0xff] }
 0x485   :  { %1473 = vmatprep.subr.bf16.mxu1 %v1472_v27  ;;  %v1506_v27 = vpack.c.bf16 %v984_v24, %v983_v23  ;;  %v1508_v28 = vpack.c.bf16 %v1002_v26, %v1001_v25 }
 0x488   :  { %1475 = vmatpush1.bf16.msra.mxu1 %v1474_v32  ;;  %v1004_v32 = vld [vmem:[%s1929_s9 + $0xb8] sm:$0xff] }
 0x489   :  { %1477 = vmatprep.subr.bf16.mxu1 %v1476_v33  ;;  %v1510_v33 = vpack.c.bf16 %v986_v30, %v985_v29  ;;  %v1512_v34 = vpack.c.bf16 %v1004_v32, %v1003_v31 }
 0x48c   :  { %1479 = vmatpush1.bf16.msra.mxu1 %v1478_v38  ;;  %v1006_v38 = vld [vmem:[%s1929_s9 + $0xc8] sm:$0xff] }
 0x48d   :  { %1481 = vmatprep.subr.bf16.mxu1 %v1480_v39  ;;  %v1514_v39 = vpack.c.bf16 %v988_v36, %v987_v35  ;;  %v1516_v40 = vpack.c.bf16 %v1006_v38, %v1005_v37 }
 0x490   :  { %1483 = vmatpush1.bf16.msra.mxu1 %v1482_v44  ;;  %v1008_v44 = vld [vmem:[%s1929_s9 + $0xd8] sm:$0xff] }
 0x491   :  { %1485 = vmatprep.subr.bf16.mxu1 %v1484_v45  ;;  %v1518_v45 = vpack.c.bf16 %v990_v42, %v989_v41  ;;  %v1520_v46 = vpack.c.bf16 %v1008_v44, %v1007_v43 }
 0x494   :  { %1487 = vmatpush1.bf16.msra.mxu1 %v1486_v50  ;;  %v1010_v50 = vld [vmem:[%s1929_s9 + $0xe8] sm:$0xff] }
 0x495   :  { %1489 = vmatprep.subr.bf16.mxu1 %v1488_v51  ;;  %v1522_v51 = vpack.c.bf16 %v992_v48, %v991_v47  ;;  %v1524_v52 = vpack.c.bf16 %v1010_v50, %v1009_v49 }
 0x498   :  { %1491 = vmatpush1.bf16.msra.mxu1 %v1490_v56 }
 0x499   :  { %1493 = vmatprep.subr.bf16.mxu1 %v1492_v57 }
 0x49c   :  { %1495 = vmatpush1.bf16.msra.mxu1 %v1494_v5  ;;  %v996_v5 = vld [vmem:[%s1929_s9 + $0x78] sm:$0xff] }
 0x49d   :  { %1497 = vmatprep.subr.bf16.mxu1 %v1496_v8  ;;  %v1530_v6 = vpack.c.bf16 %v996_v5, %v995_v4  ;;  %v901_v8 = vrot.slane %v1128_v7, %v1794_v13 }
 0x4a0   :  { %1499 = vmatpush1.bf16.msra.mxu1 %v1498_v11 }
 0x536   :  { %v672_v61 = vpop.f32.mrb[2].mxu1 }
 0x537   :  { %v673_v62 = vadd.f32 %v672_v61, %v599_v59  ;;  %v674_v63 = vpop.f32.mrb[3].mxu1 }
 0x538   :  { %v675_v0 = vadd.f32 %v674_v63, %v603_v60  ;;  %v994_v63 = vld [vmem:[%s1929_s9 + $0x68] sm:$0xff] }
 0x539   :  { %v677_v2 = vmax.f32 %v673_v62, 0.0  ;;  %v993_v62 = vld [vmem:[%s1929_s9 + $0x60] sm:$0xff] }
 0x53a   :  { %v678_v1 = vmax.f32 %v675_v0, 0.0  ;;  %v1526_v0 = vpack.c.bf16 %v994_v63, %v993_v62 }
 0x53c   :  { %821 = vmatprep.mubr.f32.mxu0 %v678_v1  ;;  %v1011_v1 = vld [vmem:[%s1929_s9 + $0xf0] sm:$0xff] }
 0x53d   :  { %822 = vmatmul.mubr.f32.vlgmr.msra.gmra.mrb[8].mxu0 %v677_v2  ;;  %v1012_v2 = vld [vmem:[%s1929_s9 + $0xf8] sm:$0xff] }
 0x53e   :  { %1503 = vmatpush3.bf16.msra.mxu0 %v1502_v21  ;;  %v1528_v3 = vpack.c.bf16 %v1012_v2, %v1011_v1 }
 0x53f   :  { %1505 = vmatprep.subr.bf16.mxu0 %v1504_v22 }
 0x542   :  { %1507 = vmatpush3.bf16.msra.mxu0 %v1506_v27 }
 0x543   :  { %1509 = vmatprep.subr.bf16.mxu0 %v1508_v28 }
 0x546   :  { %1511 = vmatpush3.bf16.msra.mxu0 %v1510_v33 }
 0x547   :  { %1513 = vmatprep.subr.bf16.mxu0 %v1512_v34 }
 0x54a   :  { %1515 = vmatpush3.bf16.msra.mxu0 %v1514_v39 }
 0x54b   :  { %1517 = vmatprep.subr.bf16.mxu0 %v1516_v40 }
 0x54e   :  { %1519 = vmatpush3.bf16.msra.mxu0 %v1518_v45 }
 0x54f   :  { %1521 = vmatprep.subr.bf16.mxu0 %v1520_v46 }
 0x552   :  { %1523 = vmatpush3.bf16.msra.mxu0 %v1522_v51 }
 0x553   :  { %1525 = vmatprep.subr.bf16.mxu0 %v1524_v52 }
 0x556   :  { %1527 = vmatpush3.bf16.msra.mxu0 %v1526_v0 }
 0x557   :  { %1529 = vmatprep.subr.bf16.mxu0 %v1528_v3 }
 0x55a   :  { %1531 = vmatpush3.bf16.msra.mxu0 %v1530_v6 }
 0x610   :  { %v823_v56 = vpop.f32.mrb[8].mxu0 }
 0x611   :  { %v824_v57 = vadd.f32 %v823_v56, %v750_v54  ;;  %v825_v58 = vpop.f32.mrb[9].mxu0 }
 0x612   :  { %v826_v59 = vadd.f32 %v825_v58, %v754_v55 }
 0x613   :  { %v828_v61 = vmax.f32 %v824_v57, 0.0 }
 0x614   :  { %v829_v60 = vmax.f32 %v826_v59, 0.0 }
 0x616   :  { %972 = vmatprep.mubr.f32.mxu1 %v829_v60 }
 0x617   :  { %973 = vmatmul.mubr.f32.vlgmr.msra.gmra.mrb[4].mxu1 %v828_v61 }
 0x6ea   :  { %v974_v10 = vpop.f32.mrb[4].mxu1 }
 0x6eb   :  { %v975_v11 = vadd.f32 %v974_v10, %v901_v8  ;;  %v976_v12 = vpop.f32.mrb[5].mxu1 }
 0x6ec   :  { %v977_v14 = vadd.f32 %v976_v12, %v905_v9 }
 0x6ed   :  { %v979_v17 = vmax.f32 %v975_v11, 0.0 }
 0x6ee   :  { %v980_v16 = vmax.f32 %v977_v14, 0.0 }
 0x6f0   :  { %1084 = vmatprep.mubr.f32.mxu0 %v980_v16 }
 0x6f1   :  { %1085 = vmatmul.mubr.f32.vlgmr.msra.gmra.mrb[10].mxu0 %v979_v17 }
 0x7c4   :  { %v1191_v18 = vpop.f32.mrb[10].mxu0 }
 0x7c5   :  { %v1192_v20 = vpop.f32.mrb[11].mxu0 }
 0x7c6   :  { %v1193_v21 = vadd.f32 %v1192_v20, %v1191_v18 }
 0x7c8   :  { %v1087_v22 = vadd.f32 %v1193_v21, %v1129_v19 }
 0x7ca   :  { %v1090_v13 = vmax.f32 %v1087_v22, 0.0 }
 0x7cc   :  { %1092 = vst.msk [vmem:[%s1931_s11] sm:$0xff] %vm1091_vm4, %v1090_v13 }
 0x7cd   :  { %1097 = vsyncpa [#allocation3], 1 }
 0x7ce   :  { %1098 = vsyncpa [#allocation5], 1 }

</bundles_post_ra>
